<compile_context>
chip_gen: v7x
topology: tpu7x:2x2x1
jax: 0.10.0
libtpu: 0.0.40
codegen_flags: <defaults>
</compile_context>

<pallas_src>
import functools
import math

import jax
import jax.numpy as jnp
from jax import lax
from jax.experimental import pallas as pl
from jax.experimental.pallas import tpu as pltpu

# ---- small Llama-2 style config (synthetic) ----
CFG = dict(
    vocab=256,
    hidden=128,
    n_heads=4,
    head_dim=32,
    intermediate=256,
    n_layers=2,
    rope_theta=10000.0,
    rms_eps=1e-5,
)


# ---------------------------------------------------------------------------
# Fused whole-model Pallas kernel (one grid step per batch element)
# ---------------------------------------------------------------------------

def _fused_llama_kernel(tok_ref, embed_ref, cos_ref, sin_ref,
                        wqkv_ref, wo_ref, wgu_ref, wd_ref,
                        lmhead_ref, o_ref):
    H = CFG["hidden"]
    nH = CFG["n_heads"]
    hd = CFG["head_dim"]
    L = CFG["n_layers"]
    V = CFG["vocab"]
    I = CFG["intermediate"]
    eps = CFG["rms_eps"]
    S = cos_ref.shape[0]

    cos = cos_ref[...]                                   # (S, H) f32
    sin = sin_ref[...]                                   # (S, H) f32

    # --- token embedding as a one-hot matmul (gather-free, MXU path) ---
    tok = tok_ref[...]                                   # (S, 1) int32
    vocab_iota = lax.broadcasted_iota(jnp.int32, (S, V), 1)
    onehot = (vocab_iota == tok).astype(jnp.bfloat16)    # (S, V)
    x = jnp.dot(onehot, embed_ref[...],
                preferred_element_type=jnp.float32)      # (S, H) f32

    # causal mask only (reference passes attention_mask = ones -> no padding)
    ri = lax.broadcasted_iota(jnp.int32, (S, S), 0)
    ci = lax.broadcasted_iota(jnp.int32, (S, S), 1)
    causal = ri >= ci

    def rmsnorm(v):                                      # gamma pre-folded into W
        var = jnp.mean(v * v, axis=-1, keepdims=True)
        return v * lax.rsqrt(var + eps)

    for l in range(L):                                   # static unroll
        # ---------------- self-attention block ----------------
        h = rmsnorm(x).astype(jnp.bfloat16)              # (S, H)
        # single fused projection: [q*scale | (q@rot)*scale | k | k@rot | v]
        qkv = jnp.dot(h, wqkv_ref[l],
                      preferred_element_type=jnp.float32)   # (S, 5H)
        q = qkv[:, 0 * H:1 * H]
        qr = qkv[:, 1 * H:2 * H]
        k = qkv[:, 2 * H:3 * H]
        kr = qkv[:, 3 * H:4 * H]
        v = qkv[:, 4 * H:5 * H]

        # RoPE (HF rotate_half convention); rotation pre-folded into *_rot
        # weight columns, 1/sqrt(hd) pre-folded into q columns.
        q = q * cos + qr * sin
        k = k * cos + kr * sin

        qb = q.astype(jnp.bfloat16)
        kb = k.astype(jnp.bfloat16)
        vb = v.astype(jnp.bfloat16)

        heads = []
        for hh in range(nH):                             # static unroll
            lo = hh * hd
            qh = qb[:, lo:lo + hd]                       # (S, hd)
            kh = kb[:, lo:lo + hd]
            vh = vb[:, lo:lo + hd]
            s = lax.dot_general(qh, kh, (((1,), (1,)), ((), ())),
                                preferred_element_type=jnp.float32)  # (S, S)
            s = jnp.where(causal, s, -1e30)
            m = jnp.max(s, axis=-1, keepdims=True)
            p = jnp.exp(s - m)                           # f32 softmax
            inv = pl.reciprocal(jnp.sum(p, axis=-1, keepdims=True), approx=True)
            p = (p * inv).astype(jnp.bfloat16)
            heads.append(jnp.dot(p, vh, preferred_element_type=jnp.float32))
        attn = jnp.concatenate(heads, axis=1).astype(jnp.bfloat16)   # (S, H)
        x = x + jnp.dot(attn, wo_ref[l],
                        preferred_element_type=jnp.float32)

        # ---------------- SwiGLU MLP block ----------------
        h2 = rmsnorm(x).astype(jnp.bfloat16)
        gu = jnp.dot(h2, wgu_ref[l],
                     preferred_element_type=jnp.float32)    # (S, 2I)
        g = gu[:, :I]
        u = gu[:, I:]
        act = (g * jax.nn.sigmoid(g) * u).astype(jnp.bfloat16)   # SiLU in f32
        x = x + jnp.dot(act, wd_ref[l], preferred_element_type=jnp.float32)

    # ---------------- final norm + lm_head (gamma folded into lm_head) ----
    xf = rmsnorm(x).astype(jnp.bfloat16)
    o_ref[...] = jnp.dot(xf, lmhead_ref[...],
                         preferred_element_type=jnp.float32)     # (S, V)


# ---------------------------------------------------------------------------
# Parameter init (deterministic, synthetic) + packing for the fused kernel
# ---------------------------------------------------------------------------

def rope_tables(S, hd, theta):
    inv_freq = 1.0 / (theta ** (jnp.arange(0, hd, 2, dtype=jnp.float32) / hd))
    pos = jnp.arange(S, dtype=jnp.float32)
    freqs = jnp.outer(pos, inv_freq)                 # (S, hd/2)
    emb = jnp.concatenate([freqs, freqs], axis=-1)   # (S, hd)
    return jnp.cos(emb), jnp.sin(emb)


def rotate_half_matrix(hd, nH):
    """(H, H) block-diagonal matrix s.t. x @ R == rotate_half(x) per head."""
    half = hd // 2
    r = jnp.zeros((hd, hd), jnp.float32)
    r = r.at[half:, :half].set(-jnp.eye(half, dtype=jnp.float32))
    r = r.at[:half, half:].set(jnp.eye(half, dtype=jnp.float32))
    return jnp.kron(jnp.eye(nH, dtype=jnp.float32), r)


def init_params(key):
    H, I, V = CFG["hidden"], CFG["intermediate"], CFG["vocab"]
    keys = jax.random.split(key, 2 + CFG["n_layers"])
    params = {
        "embed": 0.02 * jax.random.normal(keys[0], (V, H), jnp.float32),
        "lm_head": 0.02 * jax.random.normal(keys[1], (H, V), jnp.float32),
        "final_norm": jnp.ones((1, H), jnp.float32),
        "layers": [],
    }
    for l in range(CFG["n_layers"]):
        lk = jax.random.split(keys[2 + l], 7)
        params["layers"].append(dict(
            attn_norm=jnp.ones((1, H), jnp.float32),
            # weights stored as (in, out), i.e. pre-transposed PyTorch Linear
            wq=0.02 * jax.random.normal(lk[0], (H, H), jnp.float32),
            wk=0.02 * jax.random.normal(lk[1], (H, H), jnp.float32),
            wv=0.02 * jax.random.normal(lk[2], (H, H), jnp.float32),
            wo=0.02 * jax.random.normal(lk[3], (H, H), jnp.float32),
            mlp_norm=jnp.ones((1, H), jnp.float32),
            wg=0.02 * jax.random.normal(lk[4], (H, I), jnp.float32),
            wu=0.02 * jax.random.normal(lk[5], (H, I), jnp.float32),
            wd=0.02 * jax.random.normal(lk[6], (I, H), jnp.float32),
        ))
    return params


def pack_params(params):
    """Fuse/pre-fold weights for the kernel:
       - q/q_rot/k/k_rot/v -> one (H, 5H) matrix; gate/up -> one (H, 2I).
       - RoPE rotate_half folded into the *_rot columns.
       - 1/sqrt(head_dim) folded into the q columns.
       - RMSNorm gammas folded into the rows of the downstream projections.
       - everything fed to the MXU cast to bf16 (f32 accumulation in-kernel)."""
    nH, hd = CFG["n_heads"], CFG["head_dim"]
    H, I = CFG["hidden"], CFG["intermediate"]
    scale = 1.0 / math.sqrt(hd)
    rot = rotate_half_matrix(hd, nH)

    wqkv, wo, wgu, wd = [], [], [], []
    for layer in params["layers"]:
        g_attn = layer["attn_norm"].reshape(H, 1)        # fold along input dim
        g_mlp = layer["mlp_norm"].reshape(H, 1)
        wq_s = layer["wq"] * scale
        wqkv.append(g_attn * jnp.concatenate(
            [wq_s, wq_s @ rot,
             layer["wk"], layer["wk"] @ rot,
             layer["wv"]], axis=1))                      # (H, 5H)
        wo.append(layer["wo"])                           # (H, H)
        wgu.append(g_mlp * jnp.concatenate(
            [layer["wg"], layer["wu"]], axis=1))         # (H, 2I)
        wd.append(layer["wd"])                           # (I, H)

    g_final = params["final_norm"].reshape(H, 1)
    return dict(
        embed=params["embed"].astype(jnp.bfloat16),              # (V, H)
        lm_head=(g_final * params["lm_head"]).astype(jnp.bfloat16),  # (H, V)
        wqkv=jnp.stack(wqkv).astype(jnp.bfloat16),               # (L, H, 5H)
        wo=jnp.stack(wo).astype(jnp.bfloat16),                   # (L, H, H)
        wgu=jnp.stack(wgu).astype(jnp.bfloat16),                 # (L, H, 2I)
        wd=jnp.stack(wd).astype(jnp.bfloat16),                   # (L, I, H)
    )


# ---------------------------------------------------------------------------
# Forward pass: one pallas_call for the whole model
# ---------------------------------------------------------------------------

def llama_forward(packed, tokens):
    B, S = tokens.shape
    H, V = CFG["hidden"], CFG["vocab"]
    nH, hd = CFG["n_heads"], CFG["head_dim"]
    L, I = CFG["n_layers"], CFG["intermediate"]

    cos, sin = rope_tables(S, hd, CFG["rope_theta"])
    cosf = jnp.tile(cos, (1, nH))                      # (S, H): heads on lanes
    sinf = jnp.tile(sin, (1, nH))
    tok3 = tokens.astype(jnp.int32).reshape(B, S, 1)

    const2 = lambda b: (0, 0)
    const3 = lambda b: (0, 0, 0)

    logits = pl.pallas_call(
        _fused_llama_kernel,
        out_shape=jax.ShapeDtypeStruct((B, S, V), jnp.float32),
        grid=(B,),
        in_specs=[
            pl.BlockSpec((None, S, 1), lambda b: (b, 0, 0)),   # tokens
            pl.BlockSpec((V, H), const2),                      # embed table
            pl.BlockSpec((S, H), const2),                      # cos
            pl.BlockSpec((S, H), const2),                      # sin
            pl.BlockSpec((L, H, 5 * H), const3),               # fused q/qr/k/kr/v
            pl.BlockSpec((L, H, H), const3),                   # o_proj
            pl.BlockSpec((L, H, 2 * I), const3),               # fused gate/up
            pl.BlockSpec((L, I, H), const3),                   # down
            pl.BlockSpec((H, V), const2),                      # lm_head (norm folded)
        ],
        out_specs=pl.BlockSpec((None, S, V), lambda b: (b, 0, 0)),
        compiler_params=pltpu.CompilerParams(
            dimension_semantics=("parallel",)),                # v7x: 2 TCs
    )(tok3, packed["embed"], cosf, sinf, packed["wqkv"], packed["wo"],
      packed["wgu"], packed["wd"], packed["lm_head"])
    return logits


if __name__ == "__main__":
    key = jax.random.PRNGKey(0)
    pkey, tkey = jax.random.split(key)
    params = init_params(pkey)
    packed = pack_params(params)

    B, S = 2, 8
    tokens = jax.random.randint(tkey, (B, S), 0, CFG["vocab"], dtype=jnp.int32)

    fwd = jax.jit(functools.partial(llama_forward, packed))
    logits = fwd(tokens)
    jax.block_until_ready(logits)

    assert logits.shape == (B, S, CFG["vocab"])
    assert logits.dtype == jnp.float32
    assert bool(jnp.all(jnp.isfinite(logits)))
    print("KERNEL_OK")
</pallas_src>

<mosaic_0001>
module attributes {stable_mosaic.version = 11 : i64} {
  func.func @_fused_llama_kernel(%arg0: i32, %arg1: memref<1x8x1xi32, #tpu.memory_space<vmem>>, %arg2: memref<256x128xbf16, #tpu.memory_space<vmem>>, %arg3: memref<8x128xf32, #tpu.memory_space<vmem>>, %arg4: memref<8x128xf32, #tpu.memory_space<vmem>>, %arg5: memref<2x128x640xbf16, #tpu.memory_space<vmem>>, %arg6: memref<2x128x128xbf16, #tpu.memory_space<vmem>>, %arg7: memref<2x128x512xbf16, #tpu.memory_space<vmem>>, %arg8: memref<2x256x128xbf16, #tpu.memory_space<vmem>>, %arg9: memref<128x256xbf16, #tpu.memory_space<vmem>>, %arg10: memref<1x8x256xf32, #tpu.memory_space<vmem>>) attributes {dimension_semantics = [#tpu.dimension_semantics<parallel>], iteration_bounds = array<i64: 2>, scalar_prefetch = 0 : i64, scratch_operands = 0 : i64, tpu.core_type = #tpu.core_type<tc>, window_params = [{transform_indices = @transform_0, window_bounds = array<i64: 1, 8, 1>}, {pipeline_mode = #tpu.pipeline_mode<synchronous>, transform_indices = @transform_1, window_bounds = array<i64: 256, 128>}, {pipeline_mode = #tpu.pipeline_mode<synchronous>, transform_indices = @transform_2, window_bounds = array<i64: 8, 128>}, {pipeline_mode = #tpu.pipeline_mode<synchronous>, transform_indices = @transform_3, window_bounds = array<i64: 8, 128>}, {pipeline_mode = #tpu.pipeline_mode<synchronous>, transform_indices = @transform_4, window_bounds = array<i64: 2, 128, 640>}, {pipeline_mode = #tpu.pipeline_mode<synchronous>, transform_indices = @transform_5, window_bounds = array<i64: 2, 128, 128>}, {pipeline_mode = #tpu.pipeline_mode<synchronous>, transform_indices = @transform_6, window_bounds = array<i64: 2, 128, 512>}, {pipeline_mode = #tpu.pipeline_mode<synchronous>, transform_indices = @transform_7, window_bounds = array<i64: 2, 256, 128>}, {pipeline_mode = #tpu.pipeline_mode<synchronous>, transform_indices = @transform_8, window_bounds = array<i64: 128, 256>}, {transform_indices = @transform_9, window_bounds = array<i64: 1, 8, 256>}]} {
    %c0 = arith.constant 0 : index
    %c0_0 = arith.constant 0 : index
    %0 = vector.load %arg3[%c0, %c0_0] : memref<8x128xf32, #tpu.memory_space<vmem>>, vector<8x128xf32>
    %c0_1 = arith.constant 0 : index
    %c0_2 = arith.constant 0 : index
    %1 = vector.load %arg4[%c0_1, %c0_2] : memref<8x128xf32, #tpu.memory_space<vmem>>, vector<8x128xf32>
    %c0_3 = arith.constant 0 : index
    %c0_4 = arith.constant 0 : index
    %c0_5 = arith.constant 0 : index
    %2 = vector.load %arg1[%c0_3, %c0_4, %c0_5] : memref<1x8x1xi32, #tpu.memory_space<vmem>>, vector<1x8x1xi32>
    %3 = vector.shape_cast %2 : vector<1x8x1xi32> to vector<8x1xi32>
    %4 = tpu.iota {dimensions = array<i32: 1>} : vector<8x256xi32>
    %5 = vector.broadcast %3 : vector<8x1xi32> to vector<8x256xi32>
    %6 = arith.cmpi eq, %4, %5 : vector<8x256xi32>
    %7 = arith.extui %6 : vector<8x256xi1> to vector<8x256xi32>
    %8 = arith.sitofp %7 : vector<8x256xi32> to vector<8x256xf32>
    %9 = arith.truncf %8 : vector<8x256xf32> to vector<8x256xbf16>
    %c0_6 = arith.constant 0 : index
    %c0_7 = arith.constant 0 : index
    %10 = vector.load %arg2[%c0_6, %c0_7] : memref<256x128xbf16, #tpu.memory_space<vmem>>, vector<256x128xbf16>
    %cst = arith.constant dense<0.000000e+00> : vector<8x128xf32>
    %11 = tpu.matmul %9, %10, %cst {dimension_numbers = #tpu.dot_dimension_numbers<[1], [0], [0], [1], [0, 0, 1, 1], [], []>} : vector<8x256xbf16>, vector<256x128xbf16>, vector<8x128xf32> -> vector<8x128xf32>
    %12 = tpu.iota {dimensions = array<i32: 0>} : vector<8x8xi32>
    %13 = tpu.iota {dimensions = array<i32: 1>} : vector<8x8xi32>
    %14 = arith.cmpi sge, %12, %13 : vector<8x8xi32>
    %15 = arith.mulf %11, %11 : vector<8x128xf32>
    %cst_8 = arith.constant dense<0.000000e+00> : vector<8xf32>
    %16 = vector.multi_reduction <add>, %15, %cst_8 [1] : vector<8x128xf32> to vector<8xf32>
    %17 = vector.shape_cast %16 : vector<8xf32> to vector<8x1xf32>
    %cst_9 = arith.constant 1.280000e+02 : f32
    %18 = vector.broadcast %cst_9 : f32 to vector<8x1xf32>
    %19 = arith.divf %17, %18 : vector<8x1xf32>
    %cst_10 = arith.constant 9.99999974E-6 : f32
    %20 = vector.broadcast %cst_10 : f32 to vector<8x1xf32>
    %21 = arith.addf %19, %20 : vector<8x1xf32>
    %22 = math.rsqrt %21 : vector<8x1xf32>
    %23 = vector.broadcast %22 : vector<8x1xf32> to vector<8x128xf32>
    %24 = arith.mulf %11, %23 : vector<8x128xf32>
    %25 = arith.truncf %24 : vector<8x128xf32> to vector<8x128xbf16>
    %c0_11 = arith.constant 0 : index
    %c0_12 = arith.constant 0 : index
    %c0_13 = arith.constant 0 : index
    %26 = vector.load %arg5[%c0_11, %c0_12, %c0_13] : memref<2x128x640xbf16, #tpu.memory_space<vmem>>, vector<1x128x640xbf16>
    %27 = vector.shape_cast %26 : vector<1x128x640xbf16> to vector<128x640xbf16>
    %cst_14 = arith.constant dense<0.000000e+00> : vector<8x640xf32>
    %28 = tpu.matmul %25, %27, %cst_14 {dimension_numbers = #tpu.dot_dimension_numbers<[1], [0], [0], [1], [0, 0, 1, 1], [], []>} : vector<8x128xbf16>, vector<128x640xbf16>, vector<8x640xf32> -> vector<8x640xf32>
    %29 = vector.extract_strided_slice %28 {offsets = [0, 0], sizes = [8, 128], strides = [1, 1]} : vector<8x640xf32> to vector<8x128xf32>
    %30 = vector.extract_strided_slice %28 {offsets = [0, 128], sizes = [8, 128], strides = [1, 1]} : vector<8x640xf32> to vector<8x128xf32>
    %31 = vector.extract_strided_slice %28 {offsets = [0, 256], sizes = [8, 128], strides = [1, 1]} : vector<8x640xf32> to vector<8x128xf32>
    %32 = vector.extract_strided_slice %28 {offsets = [0, 384], sizes = [8, 128], strides = [1, 1]} : vector<8x640xf32> to vector<8x128xf32>
    %33 = vector.extract_strided_slice %28 {offsets = [0, 512], sizes = [8, 128], strides = [1, 1]} : vector<8x640xf32> to vector<8x128xf32>
    %34 = arith.mulf %29, %0 : vector<8x128xf32>
    %35 = arith.mulf %30, %1 : vector<8x128xf32>
    %36 = arith.addf %34, %35 : vector<8x128xf32>
    %37 = arith.mulf %31, %0 : vector<8x128xf32>
    %38 = arith.mulf %32, %1 : vector<8x128xf32>
    %39 = arith.addf %37, %38 : vector<8x128xf32>
    %40 = arith.truncf %36 : vector<8x128xf32> to vector<8x128xbf16>
    %41 = arith.truncf %39 : vector<8x128xf32> to vector<8x128xbf16>
    %42 = arith.truncf %33 : vector<8x128xf32> to vector<8x128xbf16>
    %43 = vector.extract_strided_slice %40 {offsets = [0, 0], sizes = [8, 32], strides = [1, 1]} : vector<8x128xbf16> to vector<8x32xbf16>
    %44 = vector.extract_strided_slice %41 {offsets = [0, 0], sizes = [8, 32], strides = [1, 1]} : vector<8x128xbf16> to vector<8x32xbf16>
    %45 = vector.extract_strided_slice %42 {offsets = [0, 0], sizes = [8, 32], strides = [1, 1]} : vector<8x128xbf16> to vector<8x32xbf16>
    %cst_15 = arith.constant dense<0.000000e+00> : vector<8x8xf32>
    %46 = tpu.matmul %43, %44, %cst_15 {dimension_numbers = #tpu.dot_dimension_numbers<[1], [1], [0], [0], [0, 0, 1, 0], [], []>} : vector<8x32xbf16>, vector<8x32xbf16>, vector<8x8xf32> -> vector<8x8xf32>
    %cst_16 = arith.constant -1.000000e+30 : f32
    %47 = vector.broadcast %cst_16 : f32 to vector<8x8xf32>
    %48 = arith.select %14, %46, %47 : vector<8x8xi1>, vector<8x8xf32>
    %cst_17 = arith.constant dense<0xFF800000> : vector<8xf32>
    %49 = vector.multi_reduction <maximumf>, %48, %cst_17 [1] : vector<8x8xf32> to vector<8xf32>
    %50 = vector.shape_cast %49 : vector<8xf32> to vector<8x1xf32>
    %51 = vector.broadcast %50 : vector<8x1xf32> to vector<8x8xf32>
    %52 = arith.subf %48, %51 : vector<8x8xf32>
    %53 = math.exp %52 : vector<8x8xf32>
    %cst_18 = arith.constant dense<0.000000e+00> : vector<8xf32>
    %54 = vector.multi_reduction <add>, %53, %cst_18 [1] : vector<8x8xf32> to vector<8xf32>
    %55 = vector.shape_cast %54 : vector<8xf32> to vector<8x1xf32>
    %56 = tpu.reciprocal %55 {approx = true} : vector<8x1xf32> -> vector<8x1xf32>
    %57 = vector.broadcast %56 : vector<8x1xf32> to vector<8x8xf32>
    %58 = arith.mulf %53, %57 : vector<8x8xf32>
    %59 = arith.truncf %58 : vector<8x8xf32> to vector<8x8xbf16>
    %cst_19 = arith.constant dense<0.000000e+00> : vector<8x32xf32>
    %60 = tpu.matmul %59, %45, %cst_19 {dimension_numbers = #tpu.dot_dimension_numbers<[1], [0], [0], [1], [0, 0, 1, 1], [], []>} : vector<8x8xbf16>, vector<8x32xbf16>, vector<8x32xf32> -> vector<8x32xf32>
    %61 = vector.extract_strided_slice %40 {offsets = [0, 32], sizes = [8, 32], strides = [1, 1]} : vector<8x128xbf16> to vector<8x32xbf16>
    %62 = vector.extract_strided_slice %41 {offsets = [0, 32], sizes = [8, 32], strides = [1, 1]} : vector<8x128xbf16> to vector<8x32xbf16>
    %63 = vector.extract_strided_slice %42 {offsets = [0, 32], sizes = [8, 32], strides = [1, 1]} : vector<8x128xbf16> to vector<8x32xbf16>
    %cst_20 = arith.constant dense<0.000000e+00> : vector<8x8xf32>
    %64 = tpu.matmul %61, %62, %cst_20 {dimension_numbers = #tpu.dot_dimension_numbers<[1], [1], [0], [0], [0, 0, 1, 0], [], []>} : vector<8x32xbf16>, vector<8x32xbf16>, vector<8x8xf32> -> vector<8x8xf32>
    %cst_21 = arith.constant -1.000000e+30 : f32
    %65 = vector.broadcast %cst_21 : f32 to vector<8x8xf32>
    %66 = arith.select %14, %64, %65 : vector<8x8xi1>, vector<8x8xf32>
    %cst_22 = arith.constant dense<0xFF800000> : vector<8xf32>
    %67 = vector.multi_reduction <maximumf>, %66, %cst_22 [1] : vector<8x8xf32> to vector<8xf32>
    %68 = vector.shape_cast %67 : vector<8xf32> to vector<8x1xf32>
    %69 = vector.broadcast %68 : vector<8x1xf32> to vector<8x8xf32>
    %70 = arith.subf %66, %69 : vector<8x8xf32>
    %71 = math.exp %70 : vector<8x8xf32>
    %cst_23 = arith.constant dense<0.000000e+00> : vector<8xf32>
    %72 = vector.multi_reduction <add>, %71, %cst_23 [1] : vector<8x8xf32> to vector<8xf32>
    %73 = vector.shape_cast %72 : vector<8xf32> to vector<8x1xf32>
    %74 = tpu.reciprocal %73 {approx = true} : vector<8x1xf32> -> vector<8x1xf32>
    %75 = vector.broadcast %74 : vector<8x1xf32> to vector<8x8xf32>
    %76 = arith.mulf %71, %75 : vector<8x8xf32>
    %77 = arith.truncf %76 : vector<8x8xf32> to vector<8x8xbf16>
    %cst_24 = arith.constant dense<0.000000e+00> : vector<8x32xf32>
    %78 = tpu.matmul %77, %63, %cst_24 {dimension_numbers = #tpu.dot_dimension_numbers<[1], [0], [0], [1], [0, 0, 1, 1], [], []>} : vector<8x8xbf16>, vector<8x32xbf16>, vector<8x32xf32> -> vector<8x32xf32>
    %79 = vector.extract_strided_slice %40 {offsets = [0, 64], sizes = [8, 32], strides = [1, 1]} : vector<8x128xbf16> to vector<8x32xbf16>
    %80 = vector.extract_strided_slice %41 {offsets = [0, 64], sizes = [8, 32], strides = [1, 1]} : vector<8x128xbf16> to vector<8x32xbf16>
    %81 = vector.extract_strided_slice %42 {offsets = [0, 64], sizes = [8, 32], strides = [1, 1]} : vector<8x128xbf16> to vector<8x32xbf16>
    %cst_25 = arith.constant dense<0.000000e+00> : vector<8x8xf32>
    %82 = tpu.matmul %79, %80, %cst_25 {dimension_numbers = #tpu.dot_dimension_numbers<[1], [1], [0], [0], [0, 0, 1, 0], [], []>} : vector<8x32xbf16>, vector<8x32xbf16>, vector<8x8xf32> -> vector<8x8xf32>
    %cst_26 = arith.constant -1.000000e+30 : f32
    %83 = vector.broadcast %cst_26 : f32 to vector<8x8xf32>
    %84 = arith.select %14, %82, %83 : vector<8x8xi1>, vector<8x8xf32>
    %cst_27 = arith.constant dense<0xFF800000> : vector<8xf32>
    %85 = vector.multi_reduction <maximumf>, %84, %cst_27 [1] : vector<8x8xf32> to vector<8xf32>
    %86 = vector.shape_cast %85 : vector<8xf32> to vector<8x1xf32>
    %87 = vector.broadcast %86 : vector<8x1xf32> to vector<8x8xf32>
    %88 = arith.subf %84, %87 : vector<8x8xf32>
    %89 = math.exp %88 : vector<8x8xf32>
    %cst_28 = arith.constant dense<0.000000e+00> : vector<8xf32>
    %90 = vector.multi_reduction <add>, %89, %cst_28 [1] : vector<8x8xf32> to vector<8xf32>
    %91 = vector.shape_cast %90 : vector<8xf32> to vector<8x1xf32>
    %92 = tpu.reciprocal %91 {approx = true} : vector<8x1xf32> -> vector<8x1xf32>
    %93 = vector.broadcast %92 : vector<8x1xf32> to vector<8x8xf32>
    %94 = arith.mulf %89, %93 : vector<8x8xf32>
    %95 = arith.truncf %94 : vector<8x8xf32> to vector<8x8xbf16>
    %cst_29 = arith.constant dense<0.000000e+00> : vector<8x32xf32>
    %96 = tpu.matmul %95, %81, %cst_29 {dimension_numbers = #tpu.dot_dimension_numbers<[1], [0], [0], [1], [0, 0, 1, 1], [], []>} : vector<8x8xbf16>, vector<8x32xbf16>, vector<8x32xf32> -> vector<8x32xf32>
    %97 = vector.extract_strided_slice %40 {offsets = [0, 96], sizes = [8, 32], strides = [1, 1]} : vector<8x128xbf16> to vector<8x32xbf16>
    %98 = vector.extract_strided_slice %41 {offsets = [0, 96], sizes = [8, 32], strides = [1, 1]} : vector<8x128xbf16> to vector<8x32xbf16>
    %99 = vector.extract_strided_slice %42 {offsets = [0, 96], sizes = [8, 32], strides = [1, 1]} : vector<8x128xbf16> to vector<8x32xbf16>
    %cst_30 = arith.constant dense<0.000000e+00> : vector<8x8xf32>
    %100 = tpu.matmul %97, %98, %cst_30 {dimension_numbers = #tpu.dot_dimension_numbers<[1], [1], [0], [0], [0, 0, 1, 0], [], []>} : vector<8x32xbf16>, vector<8x32xbf16>, vector<8x8xf32> -> vector<8x8xf32>
    %cst_31 = arith.constant -1.000000e+30 : f32
    %101 = vector.broadcast %cst_31 : f32 to vector<8x8xf32>
    %102 = arith.select %14, %100, %101 : vector<8x8xi1>, vector<8x8xf32>
    %cst_32 = arith.constant dense<0xFF800000> : vector<8xf32>
    %103 = vector.multi_reduction <maximumf>, %102, %cst_32 [1] : vector<8x8xf32> to vector<8xf32>
    %104 = vector.shape_cast %103 : vector<8xf32> to vector<8x1xf32>
    %105 = vector.broadcast %104 : vector<8x1xf32> to vector<8x8xf32>
    %106 = arith.subf %102, %105 : vector<8x8xf32>
    %107 = math.exp %106 : vector<8x8xf32>
    %cst_33 = arith.constant dense<0.000000e+00> : vector<8xf32>
    %108 = vector.multi_reduction <add>, %107, %cst_33 [1] : vector<8x8xf32> to vector<8xf32>
    %109 = vector.shape_cast %108 : vector<8xf32> to vector<8x1xf32>
    %110 = tpu.reciprocal %109 {approx = true} : vector<8x1xf32> -> vector<8x1xf32>
    %111 = vector.broadcast %110 : vector<8x1xf32> to vector<8x8xf32>
    %112 = arith.mulf %107, %111 : vector<8x8xf32>
    %113 = arith.truncf %112 : vector<8x8xf32> to vector<8x8xbf16>
    %cst_34 = arith.constant dense<0.000000e+00> : vector<8x32xf32>
    %114 = tpu.matmul %113, %99, %cst_34 {dimension_numbers = #tpu.dot_dimension_numbers<[1], [0], [0], [1], [0, 0, 1, 1], [], []>} : vector<8x8xbf16>, vector<8x32xbf16>, vector<8x32xf32> -> vector<8x32xf32>
    %115 = tpu.concatenate %60, %78, %96, %114 in 1 : vector<8x32xf32>, vector<8x32xf32>, vector<8x32xf32>, vector<8x32xf32> -> vector<8x128xf32>
    %116 = arith.truncf %115 : vector<8x128xf32> to vector<8x128xbf16>
    %c0_35 = arith.constant 0 : index
    %c0_36 = arith.constant 0 : index
    %c0_37 = arith.constant 0 : index
    %117 = vector.load %arg6[%c0_35, %c0_36, %c0_37] : memref<2x128x128xbf16, #tpu.memory_space<vmem>>, vector<1x128x128xbf16>
    %118 = vector.shape_cast %117 : vector<1x128x128xbf16> to vector<128x128xbf16>
    %cst_38 = arith.constant dense<0.000000e+00> : vector<8x128xf32>
    %119 = tpu.matmul %116, %118, %cst_38 {dimension_numbers = #tpu.dot_dimension_numbers<[1], [0], [0], [1], [0, 0, 1, 1], [], []>} : vector<8x128xbf16>, vector<128x128xbf16>, vector<8x128xf32> -> vector<8x128xf32>
    %120 = arith.addf %11, %119 : vector<8x128xf32>
    %121 = arith.mulf %120, %120 : vector<8x128xf32>
    %cst_39 = arith.constant dense<0.000000e+00> : vector<8xf32>
    %122 = vector.multi_reduction <add>, %121, %cst_39 [1] : vector<8x128xf32> to vector<8xf32>
    %123 = vector.shape_cast %122 : vector<8xf32> to vector<8x1xf32>
    %cst_40 = arith.constant 1.280000e+02 : f32
    %124 = vector.broadcast %cst_40 : f32 to vector<8x1xf32>
    %125 = arith.divf %123, %124 : vector<8x1xf32>
    %cst_41 = arith.constant 9.99999974E-6 : f32
    %126 = vector.broadcast %cst_41 : f32 to vector<8x1xf32>
    %127 = arith.addf %125, %126 : vector<8x1xf32>
    %128 = math.rsqrt %127 : vector<8x1xf32>
    %129 = vector.broadcast %128 : vector<8x1xf32> to vector<8x128xf32>
    %130 = arith.mulf %120, %129 : vector<8x128xf32>
    %131 = arith.truncf %130 : vector<8x128xf32> to vector<8x128xbf16>
    %c0_42 = arith.constant 0 : index
    %c0_43 = arith.constant 0 : index
    %c0_44 = arith.constant 0 : index
    %132 = vector.load %arg7[%c0_42, %c0_43, %c0_44] : memref<2x128x512xbf16, #tpu.memory_space<vmem>>, vector<1x128x512xbf16>
    %133 = vector.shape_cast %132 : vector<1x128x512xbf16> to vector<128x512xbf16>
    %cst_45 = arith.constant dense<0.000000e+00> : vector<8x512xf32>
    %134 = tpu.matmul %131, %133, %cst_45 {dimension_numbers = #tpu.dot_dimension_numbers<[1], [0], [0], [1], [0, 0, 1, 1], [], []>} : vector<8x128xbf16>, vector<128x512xbf16>, vector<8x512xf32> -> vector<8x512xf32>
    %135 = vector.extract_strided_slice %134 {offsets = [0, 0], sizes = [8, 256], strides = [1, 1]} : vector<8x512xf32> to vector<8x256xf32>
    %136 = vector.extract_strided_slice %134 {offsets = [0, 256], sizes = [8, 256], strides = [1, 1]} : vector<8x512xf32> to vector<8x256xf32>
    %137 = arith.negf %135 : vector<8x256xf32>
    %138 = math.exp %137 : vector<8x256xf32>
    %cst_46 = arith.constant 1.000000e+00 : f32
    %139 = vector.broadcast %cst_46 : f32 to vector<8x256xf32>
    %140 = arith.addf %139, %138 : vector<8x256xf32>
    %141 = arith.divf %139, %140 : vector<8x256xf32>
    %142 = arith.mulf %135, %141 : vector<8x256xf32>
    %143 = arith.mulf %142, %136 : vector<8x256xf32>
    %144 = arith.truncf %143 : vector<8x256xf32> to vector<8x256xbf16>
    %c0_47 = arith.constant 0 : index
    %c0_48 = arith.constant 0 : index
    %c0_49 = arith.constant 0 : index
    %145 = vector.load %arg8[%c0_47, %c0_48, %c0_49] : memref<2x256x128xbf16, #tpu.memory_space<vmem>>, vector<1x256x128xbf16>
    %146 = vector.shape_cast %145 : vector<1x256x128xbf16> to vector<256x128xbf16>
    %cst_50 = arith.constant dense<0.000000e+00> : vector<8x128xf32>
    %147 = tpu.matmul %144, %146, %cst_50 {dimension_numbers = #tpu.dot_dimension_numbers<[1], [0], [0], [1], [0, 0, 1, 1], [], []>} : vector<8x256xbf16>, vector<256x128xbf16>, vector<8x128xf32> -> vector<8x128xf32>
    %148 = arith.addf %120, %147 : vector<8x128xf32>
    %149 = arith.mulf %148, %148 : vector<8x128xf32>
    %cst_51 = arith.constant dense<0.000000e+00> : vector<8xf32>
    %150 = vector.multi_reduction <add>, %149, %cst_51 [1] : vector<8x128xf32> to vector<8xf32>
    %151 = vector.shape_cast %150 : vector<8xf32> to vector<8x1xf32>
    %cst_52 = arith.constant 1.280000e+02 : f32
    %152 = vector.broadcast %cst_52 : f32 to vector<8x1xf32>
    %153 = arith.divf %151, %152 : vector<8x1xf32>
    %cst_53 = arith.constant 9.99999974E-6 : f32
    %154 = vector.broadcast %cst_53 : f32 to vector<8x1xf32>
    %155 = arith.addf %153, %154 : vector<8x1xf32>
    %156 = math.rsqrt %155 : vector<8x1xf32>
    %157 = vector.broadcast %156 : vector<8x1xf32> to vector<8x128xf32>
    %158 = arith.mulf %148, %157 : vector<8x128xf32>
    %159 = arith.truncf %158 : vector<8x128xf32> to vector<8x128xbf16>
    %c1 = arith.constant 1 : index
    %c0_54 = arith.constant 0 : index
    %c0_55 = arith.constant 0 : index
    %160 = vector.load %arg5[%c1, %c0_54, %c0_55] : memref<2x128x640xbf16, #tpu.memory_space<vmem>>, vector<1x128x640xbf16>
    %161 = vector.shape_cast %160 : vector<1x128x640xbf16> to vector<128x640xbf16>
    %cst_56 = arith.constant dense<0.000000e+00> : vector<8x640xf32>
    %162 = tpu.matmul %159, %161, %cst_56 {dimension_numbers = #tpu.dot_dimension_numbers<[1], [0], [0], [1], [0, 0, 1, 1], [], []>} : vector<8x128xbf16>, vector<128x640xbf16>, vector<8x640xf32> -> vector<8x640xf32>
    %163 = vector.extract_strided_slice %162 {offsets = [0, 0], sizes = [8, 128], strides = [1, 1]} : vector<8x640xf32> to vector<8x128xf32>
    %164 = vector.extract_strided_slice %162 {offsets = [0, 128], sizes = [8, 128], strides = [1, 1]} : vector<8x640xf32> to vector<8x128xf32>
    %165 = vector.extract_strided_slice %162 {offsets = [0, 256], sizes = [8, 128], strides = [1, 1]} : vector<8x640xf32> to vector<8x128xf32>
    %166 = vector.extract_strided_slice %162 {offsets = [0, 384], sizes = [8, 128], strides = [1, 1]} : vector<8x640xf32> to vector<8x128xf32>
    %167 = vector.extract_strided_slice %162 {offsets = [0, 512], sizes = [8, 128], strides = [1, 1]} : vector<8x640xf32> to vector<8x128xf32>
    %168 = arith.mulf %163, %0 : vector<8x128xf32>
    %169 = arith.mulf %164, %1 : vector<8x128xf32>
    %170 = arith.addf %168, %169 : vector<8x128xf32>
    %171 = arith.mulf %165, %0 : vector<8x128xf32>
    %172 = arith.mulf %166, %1 : vector<8x128xf32>
    %173 = arith.addf %171, %172 : vector<8x128xf32>
    %174 = arith.truncf %170 : vector<8x128xf32> to vector<8x128xbf16>
    %175 = arith.truncf %173 : vector<8x128xf32> to vector<8x128xbf16>
    %176 = arith.truncf %167 : vector<8x128xf32> to vector<8x128xbf16>
    %177 = vector.extract_strided_slice %174 {offsets = [0, 0], sizes = [8, 32], strides = [1, 1]} : vector<8x128xbf16> to vector<8x32xbf16>
    %178 = vector.extract_strided_slice %175 {offsets = [0, 0], sizes = [8, 32], strides = [1, 1]} : vector<8x128xbf16> to vector<8x32xbf16>
    %179 = vector.extract_strided_slice %176 {offsets = [0, 0], sizes = [8, 32], strides = [1, 1]} : vector<8x128xbf16> to vector<8x32xbf16>
    %cst_57 = arith.constant dense<0.000000e+00> : vector<8x8xf32>
    %180 = tpu.matmul %177, %178, %cst_57 {dimension_numbers = #tpu.dot_dimension_numbers<[1], [1], [0], [0], [0, 0, 1, 0], [], []>} : vector<8x32xbf16>, vector<8x32xbf16>, vector<8x8xf32> -> vector<8x8xf32>
    %cst_58 = arith.constant -1.000000e+30 : f32
    %181 = vector.broadcast %cst_58 : f32 to vector<8x8xf32>
    %182 = arith.select %14, %180, %181 : vector<8x8xi1>, vector<8x8xf32>
    %cst_59 = arith.constant dense<0xFF800000> : vector<8xf32>
    %183 = vector.multi_reduction <maximumf>, %182, %cst_59 [1] : vector<8x8xf32> to vector<8xf32>
    %184 = vector.shape_cast %183 : vector<8xf32> to vector<8x1xf32>
    %185 = vector.broadcast %184 : vector<8x1xf32> to vector<8x8xf32>
    %186 = arith.subf %182, %185 : vector<8x8xf32>
    %187 = math.exp %186 : vector<8x8xf32>
    %cst_60 = arith.constant dense<0.000000e+00> : vector<8xf32>
    %188 = vector.multi_reduction <add>, %187, %cst_60 [1] : vector<8x8xf32> to vector<8xf32>
    %189 = vector.shape_cast %188 : vector<8xf32> to vector<8x1xf32>
    %190 = tpu.reciprocal %189 {approx = true} : vector<8x1xf32> -> vector<8x1xf32>
    %191 = vector.broadcast %190 : vector<8x1xf32> to vector<8x8xf32>
    %192 = arith.mulf %187, %191 : vector<8x8xf32>
    %193 = arith.truncf %192 : vector<8x8xf32> to vector<8x8xbf16>
    %cst_61 = arith.constant dense<0.000000e+00> : vector<8x32xf32>
    %194 = tpu.matmul %193, %179, %cst_61 {dimension_numbers = #tpu.dot_dimension_numbers<[1], [0], [0], [1], [0, 0, 1, 1], [], []>} : vector<8x8xbf16>, vector<8x32xbf16>, vector<8x32xf32> -> vector<8x32xf32>
    %195 = vector.extract_strided_slice %174 {offsets = [0, 32], sizes = [8, 32], strides = [1, 1]} : vector<8x128xbf16> to vector<8x32xbf16>
    %196 = vector.extract_strided_slice %175 {offsets = [0, 32], sizes = [8, 32], strides = [1, 1]} : vector<8x128xbf16> to vector<8x32xbf16>
    %197 = vector.extract_strided_slice %176 {offsets = [0, 32], sizes = [8, 32], strides = [1, 1]} : vector<8x128xbf16> to vector<8x32xbf16>
    %cst_62 = arith.constant dense<0.000000e+00> : vector<8x8xf32>
    %198 = tpu.matmul %195, %196, %cst_62 {dimension_numbers = #tpu.dot_dimension_numbers<[1], [1], [0], [0], [0, 0, 1, 0], [], []>} : vector<8x32xbf16>, vector<8x32xbf16>, vector<8x8xf32> -> vector<8x8xf32>
    %cst_63 = arith.constant -1.000000e+30 : f32
    %199 = vector.broadcast %cst_63 : f32 to vector<8x8xf32>
    %200 = arith.select %14, %198, %199 : vector<8x8xi1>, vector<8x8xf32>
    %cst_64 = arith.constant dense<0xFF800000> : vector<8xf32>
    %201 = vector.multi_reduction <maximumf>, %200, %cst_64 [1] : vector<8x8xf32> to vector<8xf32>
    %202 = vector.shape_cast %201 : vector<8xf32> to vector<8x1xf32>
    %203 = vector.broadcast %202 : vector<8x1xf32> to vector<8x8xf32>
    %204 = arith.subf %200, %203 : vector<8x8xf32>
    %205 = math.exp %204 : vector<8x8xf32>
    %cst_65 = arith.constant dense<0.000000e+00> : vector<8xf32>
    %206 = vector.multi_reduction <add>, %205, %cst_65 [1] : vector<8x8xf32> to vector<8xf32>
    %207 = vector.shape_cast %206 : vector<8xf32> to vector<8x1xf32>
    %208 = tpu.reciprocal %207 {approx = true} : vector<8x1xf32> -> vector<8x1xf32>
    %209 = vector.broadcast %208 : vector<8x1xf32> to vector<8x8xf32>
    %210 = arith.mulf %205, %209 : vector<8x8xf32>
    %211 = arith.truncf %210 : vector<8x8xf32> to vector<8x8xbf16>
    %cst_66 = arith.constant dense<0.000000e+00> : vector<8x32xf32>
    %212 = tpu.matmul %211, %197, %cst_66 {dimension_numbers = #tpu.dot_dimension_numbers<[1], [0], [0], [1], [0, 0, 1, 1], [], []>} : vector<8x8xbf16>, vector<8x32xbf16>, vector<8x32xf32> -> vector<8x32xf32>
    %213 = vector.extract_strided_slice %174 {offsets = [0, 64], sizes = [8, 32], strides = [1, 1]} : vector<8x128xbf16> to vector<8x32xbf16>
    %214 = vector.extract_strided_slice %175 {offsets = [0, 64], sizes = [8, 32], strides = [1, 1]} : vector<8x128xbf16> to vector<8x32xbf16>
    %215 = vector.extract_strided_slice %176 {offsets = [0, 64], sizes = [8, 32], strides = [1, 1]} : vector<8x128xbf16> to vector<8x32xbf16>
    %cst_67 = arith.constant dense<0.000000e+00> : vector<8x8xf32>
    %216 = tpu.matmul %213, %214, %cst_67 {dimension_numbers = #tpu.dot_dimension_numbers<[1], [1], [0], [0], [0, 0, 1, 0], [], []>} : vector<8x32xbf16>, vector<8x32xbf16>, vector<8x8xf32> -> vector<8x8xf32>
    %cst_68 = arith.constant -1.000000e+30 : f32
    %217 = vector.broadcast %cst_68 : f32 to vector<8x8xf32>
    %218 = arith.select %14, %216, %217 : vector<8x8xi1>, vector<8x8xf32>
    %cst_69 = arith.constant dense<0xFF800000> : vector<8xf32>
    %219 = vector.multi_reduction <maximumf>, %218, %cst_69 [1] : vector<8x8xf32> to vector<8xf32>
    %220 = vector.shape_cast %219 : vector<8xf32> to vector<8x1xf32>
    %221 = vector.broadcast %220 : vector<8x1xf32> to vector<8x8xf32>
    %222 = arith.subf %218, %221 : vector<8x8xf32>
    %223 = math.exp %222 : vector<8x8xf32>
    %cst_70 = arith.constant dense<0.000000e+00> : vector<8xf32>
    %224 = vector.multi_reduction <add>, %223, %cst_70 [1] : vector<8x8xf32> to vector<8xf32>
    %225 = vector.shape_cast %224 : vector<8xf32> to vector<8x1xf32>
    %226 = tpu.reciprocal %225 {approx = true} : vector<8x1xf32> -> vector<8x1xf32>
    %227 = vector.broadcast %226 : vector<8x1xf32> to vector<8x8xf32>
    %228 = arith.mulf %223, %227 : vector<8x8xf32>
    %229 = arith.truncf %228 : vector<8x8xf32> to vector<8x8xbf16>
    %cst_71 = arith.constant dense<0.000000e+00> : vector<8x32xf32>
    %230 = tpu.matmul %229, %215, %cst_71 {dimension_numbers = #tpu.dot_dimension_numbers<[1], [0], [0], [1], [0, 0, 1, 1], [], []>} : vector<8x8xbf16>, vector<8x32xbf16>, vector<8x32xf32> -> vector<8x32xf32>
    %231 = vector.extract_strided_slice %174 {offsets = [0, 96], sizes = [8, 32], strides = [1, 1]} : vector<8x128xbf16> to vector<8x32xbf16>
    %232 = vector.extract_strided_slice %175 {offsets = [0, 96], sizes = [8, 32], strides = [1, 1]} : vector<8x128xbf16> to vector<8x32xbf16>
    %233 = vector.extract_strided_slice %176 {offsets = [0, 96], sizes = [8, 32], strides = [1, 1]} : vector<8x128xbf16> to vector<8x32xbf16>
    %cst_72 = arith.constant dense<0.000000e+00> : vector<8x8xf32>
    %234 = tpu.matmul %231, %232, %cst_72 {dimension_numbers = #tpu.dot_dimension_numbers<[1], [1], [0], [0], [0, 0, 1, 0], [], []>} : vector<8x32xbf16>, vector<8x32xbf16>, vector<8x8xf32> -> vector<8x8xf32>
    %cst_73 = arith.constant -1.000000e+30 : f32
    %235 = vector.broadcast %cst_73 : f32 to vector<8x8xf32>
    %236 = arith.select %14, %234, %235 : vector<8x8xi1>, vector<8x8xf32>
    %cst_74 = arith.constant dense<0xFF800000> : vector<8xf32>
    %237 = vector.multi_reduction <maximumf>, %236, %cst_74 [1] : vector<8x8xf32> to vector<8xf32>
    %238 = vector.shape_cast %237 : vector<8xf32> to vector<8x1xf32>
    %239 = vector.broadcast %238 : vector<8x1xf32> to vector<8x8xf32>
    %240 = arith.subf %236, %239 : vector<8x8xf32>
    %241 = math.exp %240 : vector<8x8xf32>
    %cst_75 = arith.constant dense<0.000000e+00> : vector<8xf32>
    %242 = vector.multi_reduction <add>, %241, %cst_75 [1] : vector<8x8xf32> to vector<8xf32>
    %243 = vector.shape_cast %242 : vector<8xf32> to vector<8x1xf32>
    %244 = tpu.reciprocal %243 {approx = true} : vector<8x1xf32> -> vector<8x1xf32>
    %245 = vector.broadcast %244 : vector<8x1xf32> to vector<8x8xf32>
    %246 = arith.mulf %241, %245 : vector<8x8xf32>
    %247 = arith.truncf %246 : vector<8x8xf32> to vector<8x8xbf16>
    %cst_76 = arith.constant dense<0.000000e+00> : vector<8x32xf32>
    %248 = tpu.matmul %247, %233, %cst_76 {dimension_numbers = #tpu.dot_dimension_numbers<[1], [0], [0], [1], [0, 0, 1, 1], [], []>} : vector<8x8xbf16>, vector<8x32xbf16>, vector<8x32xf32> -> vector<8x32xf32>
    %249 = tpu.concatenate %194, %212, %230, %248 in 1 : vector<8x32xf32>, vector<8x32xf32>, vector<8x32xf32>, vector<8x32xf32> -> vector<8x128xf32>
    %250 = arith.truncf %249 : vector<8x128xf32> to vector<8x128xbf16>
    %c1_77 = arith.constant 1 : index
    %c0_78 = arith.constant 0 : index
    %c0_79 = arith.constant 0 : index
    %251 = vector.load %arg6[%c1_77, %c0_78, %c0_79] : memref<2x128x128xbf16, #tpu.memory_space<vmem>>, vector<1x128x128xbf16>
    %252 = vector.shape_cast %251 : vector<1x128x128xbf16> to vector<128x128xbf16>
    %cst_80 = arith.constant dense<0.000000e+00> : vector<8x128xf32>
    %253 = tpu.matmul %250, %252, %cst_80 {dimension_numbers = #tpu.dot_dimension_numbers<[1], [0], [0], [1], [0, 0, 1, 1], [], []>} : vector<8x128xbf16>, vector<128x128xbf16>, vector<8x128xf32> -> vector<8x128xf32>
    %254 = arith.addf %148, %253 : vector<8x128xf32>
    %255 = arith.mulf %254, %254 : vector<8x128xf32>
    %cst_81 = arith.constant dense<0.000000e+00> : vector<8xf32>
    %256 = vector.multi_reduction <add>, %255, %cst_81 [1] : vector<8x128xf32> to vector<8xf32>
    %257 = vector.shape_cast %256 : vector<8xf32> to vector<8x1xf32>
    %cst_82 = arith.constant 1.280000e+02 : f32
    %258 = vector.broadcast %cst_82 : f32 to vector<8x1xf32>
    %259 = arith.divf %257, %258 : vector<8x1xf32>
    %cst_83 = arith.constant 9.99999974E-6 : f32
    %260 = vector.broadcast %cst_83 : f32 to vector<8x1xf32>
    %261 = arith.addf %259, %260 : vector<8x1xf32>
    %262 = math.rsqrt %261 : vector<8x1xf32>
    %263 = vector.broadcast %262 : vector<8x1xf32> to vector<8x128xf32>
    %264 = arith.mulf %254, %263 : vector<8x128xf32>
    %265 = arith.truncf %264 : vector<8x128xf32> to vector<8x128xbf16>
    %c1_84 = arith.constant 1 : index
    %c0_85 = arith.constant 0 : index
    %c0_86 = arith.constant 0 : index
    %266 = vector.load %arg7[%c1_84, %c0_85, %c0_86] : memref<2x128x512xbf16, #tpu.memory_space<vmem>>, vector<1x128x512xbf16>
    %267 = vector.shape_cast %266 : vector<1x128x512xbf16> to vector<128x512xbf16>
    %cst_87 = arith.constant dense<0.000000e+00> : vector<8x512xf32>
    %268 = tpu.matmul %265, %267, %cst_87 {dimension_numbers = #tpu.dot_dimension_numbers<[1], [0], [0], [1], [0, 0, 1, 1], [], []>} : vector<8x128xbf16>, vector<128x512xbf16>, vector<8x512xf32> -> vector<8x512xf32>
    %269 = vector.extract_strided_slice %268 {offsets = [0, 0], sizes = [8, 256], strides = [1, 1]} : vector<8x512xf32> to vector<8x256xf32>
    %270 = vector.extract_strided_slice %268 {offsets = [0, 256], sizes = [8, 256], strides = [1, 1]} : vector<8x512xf32> to vector<8x256xf32>
    %271 = arith.negf %269 : vector<8x256xf32>
    %272 = math.exp %271 : vector<8x256xf32>
    %cst_88 = arith.constant 1.000000e+00 : f32
    %273 = vector.broadcast %cst_88 : f32 to vector<8x256xf32>
    %274 = arith.addf %273, %272 : vector<8x256xf32>
    %275 = arith.divf %273, %274 : vector<8x256xf32>
    %276 = arith.mulf %269, %275 : vector<8x256xf32>
    %277 = arith.mulf %276, %270 : vector<8x256xf32>
    %278 = arith.truncf %277 : vector<8x256xf32> to vector<8x256xbf16>
    %c1_89 = arith.constant 1 : index
    %c0_90 = arith.constant 0 : index
    %c0_91 = arith.constant 0 : index
    %279 = vector.load %arg8[%c1_89, %c0_90, %c0_91] : memref<2x256x128xbf16, #tpu.memory_space<vmem>>, vector<1x256x128xbf16>
    %280 = vector.shape_cast %279 : vector<1x256x128xbf16> to vector<256x128xbf16>
    %cst_92 = arith.constant dense<0.000000e+00> : vector<8x128xf32>
    %281 = tpu.matmul %278, %280, %cst_92 {dimension_numbers = #tpu.dot_dimension_numbers<[1], [0], [0], [1], [0, 0, 1, 1], [], []>} : vector<8x256xbf16>, vector<256x128xbf16>, vector<8x128xf32> -> vector<8x128xf32>
    %282 = arith.addf %254, %281 : vector<8x128xf32>
    %283 = arith.mulf %282, %282 : vector<8x128xf32>
    %cst_93 = arith.constant dense<0.000000e+00> : vector<8xf32>
    %284 = vector.multi_reduction <add>, %283, %cst_93 [1] : vector<8x128xf32> to vector<8xf32>
    %285 = vector.shape_cast %284 : vector<8xf32> to vector<8x1xf32>
    %cst_94 = arith.constant 1.280000e+02 : f32
    %286 = vector.broadcast %cst_94 : f32 to vector<8x1xf32>
    %287 = arith.divf %285, %286 : vector<8x1xf32>
    %cst_95 = arith.constant 9.99999974E-6 : f32
    %288 = vector.broadcast %cst_95 : f32 to vector<8x1xf32>
    %289 = arith.addf %287, %288 : vector<8x1xf32>
    %290 = math.rsqrt %289 : vector<8x1xf32>
    %291 = vector.broadcast %290 : vector<8x1xf32> to vector<8x128xf32>
    %292 = arith.mulf %282, %291 : vector<8x128xf32>
    %293 = arith.truncf %292 : vector<8x128xf32> to vector<8x128xbf16>
    %c0_96 = arith.constant 0 : index
    %c0_97 = arith.constant 0 : index
    %294 = vector.load %arg9[%c0_96, %c0_97] : memref<128x256xbf16, #tpu.memory_space<vmem>>, vector<128x256xbf16>
    %cst_98 = arith.constant dense<0.000000e+00> : vector<8x256xf32>
    %295 = tpu.matmul %293, %294, %cst_98 {dimension_numbers = #tpu.dot_dimension_numbers<[1], [0], [0], [1], [0, 0, 1, 1], [], []>} : vector<8x128xbf16>, vector<128x256xbf16>, vector<8x256xf32> -> vector<8x256xf32>
    %c0_99 = arith.constant 0 : index
    %c0_100 = arith.constant 0 : index
    %c0_101 = arith.constant 0 : index
    %296 = vector.load %arg10[%c0_99, %c0_100, %c0_101] : memref<1x8x256xf32, #tpu.memory_space<vmem>>, vector<1x8x256xf32>
    %297 = vector.shape_cast %296 : vector<1x8x256xf32> to vector<8x256xf32>
    %298 = vector.shape_cast %295 : vector<8x256xf32> to vector<1x8x256xf32>
    tpu.vector_store %arg10[%c0_99, %c0_100, %c0_101], %298 {strides = array<i32>} : memref<1x8x256xf32, #tpu.memory_space<vmem>>, vector<1x8x256xf32>,
    return
  }
  func.func @transform_0(%arg0: i32) -> (i32, i32, i32) {
    %c0_i32 = arith.constant 0 : i32
    %c0_i32_0 = arith.constant 0 : i32
    %c0_i32_1 = arith.constant 0 : i32
    return %arg0, %c0_i32, %c0_i32_0 : i32, i32, i32
  }
  func.func @transform_1(%arg0: i32) -> (i32, i32) {
    %c0_i32 = arith.constant 0 : i32
    %c0_i32_0 = arith.constant 0 : i32
    %c0_i32_1 = arith.constant 0 : i32
    return %c0_i32, %c0_i32_0 : i32, i32
  }
  func.func @transform_2(%arg0: i32) -> (i32, i32) {
    %c0_i32 = arith.constant 0 : i32
    %c0_i32_0 = arith.constant 0 : i32
    %c0_i32_1 = arith.constant 0 : i32
    return %c0_i32, %c0_i32_0 : i32, i32
  }
  func.func @transform_3(%arg0: i32) -> (i32, i32) {
    %c0_i32 = arith.constant 0 : i32
    %c0_i32_0 = arith.constant 0 : i32
    %c0_i32_1 = arith.constant 0 : i32
    return %c0_i32, %c0_i32_0 : i32, i32
  }
  func.func @transform_4(%arg0: i32) -> (i32, i32, i32) {
    %c0_i32 = arith.constant 0 : i32
    %c0_i32_0 = arith.constant 0 : i32
    %c0_i32_1 = arith.constant 0 : i32
    %c0_i32_2 = arith.constant 0 : i32
    return %c0_i32, %c0_i32_0, %c0_i32_1 : i32, i32, i32
  }
  func.func @transform_5(%arg0: i32) -> (i32, i32, i32) {
    %c0_i32 = arith.constant 0 : i32
    %c0_i32_0 = arith.constant 0 : i32
    %c0_i32_1 = arith.constant 0 : i32
    %c0_i32_2 = arith.constant 0 : i32
    return %c0_i32, %c0_i32_0, %c0_i32_1 : i32, i32, i32
  }
  func.func @transform_6(%arg0: i32) -> (i32, i32, i32) {
    %c0_i32 = arith.constant 0 : i32
    %c0_i32_0 = arith.constant 0 : i32
    %c0_i32_1 = arith.constant 0 : i32
    %c0_i32_2 = arith.constant 0 : i32
    return %c0_i32, %c0_i32_0, %c0_i32_1 : i32, i32, i32
  }
  func.func @transform_7(%arg0: i32) -> (i32, i32, i32) {
    %c0_i32 = arith.constant 0 : i32
    %c0_i32_0 = arith.constant 0 : i32
    %c0_i32_1 = arith.constant 0 : i32
    %c0_i32_2 = arith.constant 0 : i32
    return %c0_i32, %c0_i32_0, %c0_i32_1 : i32, i32, i32
  }
  func.func @transform_8(%arg0: i32) -> (i32, i32) {
    %c0_i32 = arith.constant 0 : i32
    %c0_i32_0 = arith.constant 0 : i32
    %c0_i32_1 = arith.constant 0 : i32
    return %c0_i32, %c0_i32_0 : i32, i32
  }
  func.func @transform_9(%arg0: i32) -> (i32, i32, i32) {
    %c0_i32 = arith.constant 0 : i32
    %c0_i32_0 = arith.constant 0 : i32
    %c0_i32_1 = arith.constant 0 : i32
    return %arg0, %c0_i32, %c0_i32_0 : i32, i32, i32
  }
}

</mosaic_0001>

<bundles_post_ra>
// kernel: tile.19
= control target key start
LH: loop header
LB: loop body
LE: loop exit
PB: predicated region body
PF: predicated region fallthrough
CT: control target
= control target key end

     0   :  { %vm42_vm0 = vcmask 1047556   ;;  %vm44_vm1 = vcmask 261120   ;;  %s93_s22 = smov 32   ;;  %s94_s25 = smov 64   ;;  %vm54_vm2 = vcmask 1048320   ;;  %vm64_vm3 = vcmask 785920   ;;  %s146_s0 = inlined_call_operand.vmem [shape: f32[8,4,32], index: 0, kind: input, shape index: {}]   ;;  %s147_s1 = inlined_call_operand.vmem [shape: f32[8,128], index: 1, kind: output, shape index: {}]  }
   0x1   :  { %v82_v0 = vld [vmem:[%s146_s0 + $0x1c] sm:$0xf]  ;;  %v83_v1 = vld [vmem:[%s146_s0 + $0x18] sm:$0xf]  ;;  %v84_v2 = vld [vmem:[%s146_s0 + $0x14] sm:$0xf] }
   0x2   :  { %8 = vst [vmem:[#allocation0 + $0x38] sm:$0xf] %v82_v0  ;;  %13 = vst [vmem:[#allocation0 + $0x30] sm:$0xf] %v83_v1  ;;  %v85_v3 = vld [vmem:[%s146_s0 + $0x10] sm:$0xf] }
   0x3   :  { %18 = vst [vmem:[#allocation0 + $0x28] sm:$0xf] %v84_v2  ;;  %v86_v4 = vld [vmem:[%s146_s0 + $0xc] sm:$0xf]  ;;  %v87_v5 = vld [vmem:[%s146_s0 + $0x8] sm:$0xf] }
   0x4   :  { %23 = vst [vmem:[#allocation0 + $0x20] sm:$0xf] %v85_v3  ;;  %28 = vst [vmem:[#allocation0 + $0x18] sm:$0xf] %v86_v4  ;;  %v88_v6 = vld [vmem:[%s146_s0 + $0x4] sm:$0xf] }
   0x5   :  { %33 = vst [vmem:[#allocation0 + $0x10] sm:$0xf] %v87_v5  ;;  %v38_v7 = vld [vmem:[%s146_s0] sm:$0xf]  ;;  %37 = vst [vmem:[#allocation0 + $0x8] sm:$0xf] %v88_v6 }
   0x6   :  { %39 = vst [vmem:[#allocation0] sm:$0xf] %v38_v7  ;;  %s92_s0 = smov 96   ;;  %vm74_vm4 = vcmask 523520  }
   0xb   :  { %v49_v8 = vld [vmem:[#allocation0 + $0x3] ss:$8 sm:$0xf0]   ;;  %v59_v9 = vld [vmem:[#allocation0 + $0x2] ss:$8 sm:$0xf0]  }
   0xc   :  { %v69_v14 = vld [vmem:[#allocation0 + $0x1] ss:$8 sm:$0xf0]   ;;  %v41_v17 = vld [vmem:[#allocation0] ss:$8 sm:$0xf0]  }
   0xd   :  { %v47_v10 = vld [vmem:[#allocation0 + $0x3] ss:$8 sm:$0xf]   ;;  %v57_v11 = vld [vmem:[#allocation0 + $0x2] ss:$8 sm:$0xf]  }
   0xe   :  { %v51_v12 = vsel %vm42_vm0, %v49_v8, %v47_v10  ;;  %v67_v13 = vld [vmem:[#allocation0 + $0x1] ss:$8 sm:$0xf]   ;;  %v40_v16 = vld [vmem:[#allocation0] ss:$8 sm:$0xf]   ;;  %v61_v18 = vsel %vm42_vm0, %v59_v9, %v57_v11 }
   0xf   :  { %52 = vrot.lane.b32.xlu0 %v51_v12, %s92_s0  ;;  %v71_v15 = vsel %vm42_vm0, %v69_v14, %v67_v13  ;;  %v43_v19 = vsel %vm42_vm0, %v41_v17, %v40_v16 }
  0x10   :  { %72 = vrot.lane.b32.xlu1 %v71_v15, %s93_s22  ;;  %45 = vst.msk [vmem:[%s147_s1] sm:$0xff] %vm44_vm1, %v43_v19  }
  0x13   :  { %62 = vrot.lane.b32.xlu0 %v61_v18, %s94_s25 }
  0x81   :  { %v53_v20 = vpop.permute.xlu0 %52  }
  0x82   :  { %55 = vst.msk [vmem:[%s147_s1] sm:$0xff] %vm54_vm2, %v53_v20   ;;  %v73_v21 = vpop.permute.xlu1 %72  }
  0x85   :  { %v63_v22 = vpop.permute.xlu0 %62  }
  0x86   :  { %65 = vst.msk [vmem:[%s147_s1] sm:$0xff] %vm64_vm3, %v63_v22  }
  0x87   :  { %75 = vst.msk [vmem:[%s147_s1] sm:$0xff] %vm74_vm4, %v73_v21  }

// kernel: llama_forward.1
= control target key start
LH: loop header
LB: loop body
LE: loop exit
PB: predicated region body
PF: predicated region fallthrough
CT: control target
= control target key end

     0   :  { %14 = vsyncpa [#allocation3], 0  ;;  %s5862_s0 = inlined_call_operand.vmem [shape: s32[2,8,1], index: 0, kind: input, shape index: {}]   ;;  %s5863_s1 = inlined_call_operand.vmem [shape: bf16[256,128], index: 1, kind: input, shape index: {}]   ;;  %s5864_s2 = inlined_call_operand.vmem [shape: f32[8,128], index: 2, kind: input, shape index: {}]   ;;  %s5865_s3 = inlined_call_operand.vmem [shape: f32[8,128], index: 3, kind: input, shape index: {}]   ;;  %s5866_s4 = inlined_call_operand.vmem [shape: bf16[2,128,640], index: 4, kind: input, shape index: {}]   ;;  %s5867_s5 = inlined_call_operand.vmem [shape: bf16[2,128,128], index: 5, kind: input, shape index: {}]   ;;  %s5868_s6 = inlined_call_operand.vmem [shape: bf16[2,128,512], index: 6, kind: input, shape index: {}]   ;;  %s5869_s7 = inlined_call_operand.vmem [shape: bf16[2,256,128], index: 7, kind: input, shape index: {}]   ;;  %s5870_s8 = inlined_call_operand.vmem [shape: bf16[128,256], index: 8, kind: input, shape index: {}]   ;;  %s5871_s9 = inlined_call_operand.hbm [shape: f32[2,8,256], index: 9, kind: output, shape index: {}]  }
   0x1   :  { %16 = vsyncpa [#allocation3 + $0x1], 0  ;;  %s4823_s30 = smov 0   ;;  %s4825_s10 = smov 0  }
   0x2   :  { %s4827_s11 = smov 0   ;;  %s4829_s12 = smov 0  }
   0x3 LB: > { %s4844_s13 = sadd.s32 4294967295, %s4763_s12   ;;  %s3600_s14 = sadd.s32 4294967294, %s4763_s12   ;;  %s4763_s12 = sphi %s4829_s12, %s5884_s12   ;;  %s4759_s11 = sphi %s4827_s11, %s5883_s11   ;;  %s4755_s10 = sphi %s4825_s10, %s5882_s10   ;;  %s4751_s30 = sphi %s4823_s30, %s5881_s30  }
   0x4   : > { %s4848_s15 = sadd.s32 1, %s4763_s12   ;;  %s223_s16 = sadd.s32 1, %s4759_s11 }
   0x5   : > { %s220_s17 = ssub.s32 %s4763_s12, %s4848_s15  ;;  %p233_p0 = scmp.ne.s32.totalorder %s4759_s11, %s4755_s10 }
   0x6   : > { %p221_p1 = scmp.eq.s32.totalorder %s220_s17, 0  ;;  %p234_p2 = scmp.eq.s32.totalorder %s4844_s13, 1 }
   0x7   : > { %p239_p3 = scmp.ne.s32.totalorder %s4755_s10, %s4751_s30  ;;  %p240_p4 = scmp.eq.s32.totalorder %s3600_s14, 1 }
   0x8   : > { %s4859_s18 = scalar_select %p221_p1, %s4759_s11, %s223_s16  }
   0x9   : > { %p4861_p5 = por %p234_p2, %p233_p0  ;;  %p4865_p6 = por %p240_p4, %p239_p3 }
   0xa   : > { %5874 = sst [smem:[#allocation5_spill]] %s4859_s18  ;;  %p3603_p7 = scmp.ge.s32.totalorder %s4763_s12, 1 }
   0xb   : > { %p289_p8 = scmp.lt.s32.totalorder %s4763_s12, 3 }
   0xd   : > { %p290_p9 = pnand %p3603_p7, %p289_p8 }
   0xe   : > { %p324_p10 = scmp.lt.s32.totalorder (!%p290_p9), %s4844_s13, 1  ;;  %v4765_v0 = vmov (!%p290_p9), 0   ;;  %v4347_v1 = vld [vmem:[%s5863_s1 + $0x40] sm:$0xff] (!%p290_p9)   ;;  %v4349_v3 = vld [vmem:[%s5863_s1 + $0x48] sm:$0xff] (!%p290_p9)   ;;  %v4351_v5 = vld [vmem:[%s5863_s1 + $0x50] sm:$0xff] (!%p290_p9)   ;;  %v332_v18 = vlaneseq (!%p290_p9)  ;;  %v4767_v61 = vmov (!%p290_p9), 0.0  }
   0xf   : > { %293 = sbr.rel (%p290_p9) target bundleno = 6049 (0x17a1), region = 56  ;;  %4346 = vset.pattern.permute.xlu0 (!%p290_p9), %v4765_v0  ;;  %814 = vmatprep.mubr.bf16.mxu1 (!%p290_p9), %v4765_v0  ;;  %v4348_v2 = vld [vmem:[%s5863_s1] sm:$0xff] (!%p290_p9)   ;;  %v4350_v4 = vld [vmem:[%s5863_s1 + $0x8] sm:$0xff] (!%p290_p9)   ;;  %v4352_v7 = vld [vmem:[%s5863_s1 + $0x10] sm:$0xff] (!%p290_p9)   ;;  %v4766_v22 = vmov (!%p290_p9), 1.0|1.0  }
  0x10   : > { %3990 = vmatprep.subr.bf16.mxu0 (!%p290_p9), %v4347_v1  ;;  %v4353_v8 = vld [vmem:[%s5863_s1 + $0x58] sm:$0xff] (!%p290_p9)   ;;  %v4355_v10 = vld [vmem:[%s5863_s1 + $0x60] sm:$0xff] (!%p290_p9)   ;;  %v4357_v12 = vld [vmem:[%s5863_s1 + $0x68] sm:$0xff] (!%p290_p9)   ;;  %v4927_v19 = vand.u32 (!%p290_p9), 127, %v332_v18  ;;  %vm4768_vm4 = vmmov (!%p290_p9), 0   ;;  %vm913_vm5 = vcmask (!%p290_p9), 261120  }
  0x11   : > { %3991 = vmatpush3.bf16.msra.mxu0 (!%p290_p9), %v4348_v2  ;;  %v4354_v9 = vld [vmem:[%s5863_s1 + $0x18] sm:$0xff] (!%p290_p9)   ;;  %v4356_v11 = vld [vmem:[%s5863_s1 + $0x20] sm:$0xff] (!%p290_p9)   ;;  %v4358_v13 = vld [vmem:[%s5863_s1 + $0x28] sm:$0xff] (!%p290_p9)   ;;  %vm977_vm6 = vcmask (!%p290_p9), 1043456   ;;  %vm961_vm8 = vcmask (!%p290_p9), 64512   ;;  %s4770_s26 = smov (!%p290_p9), 96  }
  0x12   : > { %3992 = vmatprep.subr.bf16.mxu0 (!%p290_p9), %v4349_v3  ;;  %v4359_v14 = vld [vmem:[%s5863_s1 + $0x70] sm:$0xff] (!%p290_p9)   ;;  %v4361_v16 = vld [vmem:[%s5863_s1 + $0x78] sm:$0xff] (!%p290_p9)   ;;  %v334_v20 = vadd.s32 (!%p290_p9), 128, %v4927_v19  ;;  %v4368_v26 = vld [vmem:[%s5866_s4 + $0xc] ss:$20 sps:$4 sm:$0xff] (!%p290_p9)   ;;  %s4771_s27 = smov (!%p290_p9), 64  }
  0x13   : > { %v4360_v15 = vld [vmem:[%s5863_s1 + $0x30] sm:$0xff] (!%p290_p9)   ;;  %v4362_v17 = vld [vmem:[%s5863_s1 + $0x38] sm:$0xff] (!%p290_p9)   ;;  %v4369_v27 = vld [vmem:[%s5866_s4 + $0x2c] ss:$20 sps:$4 sm:$0xff] (!%p290_p9)   ;;  %vm1370_vm9 = vcmask (!%p290_p9), 523264   ;;  %vm1372_vm10 = vcmask (!%p290_p9), 785408  }
  0x14   : > { %v4363_v23 = vld [vmem:[%s5866_s4 + $0x4] ss:$20 sps:$4 sm:$0xff] (!%p290_p9)   ;;  %v4365_v24 = vld [vmem:[%s5866_s4] ss:$20 sps:$4 sm:$0xff] (!%p290_p9)   ;;  %v4366_v25 = vld [vmem:[%s5866_s4 + $0x8] ss:$20 sps:$4 sm:$0xff] (!%p290_p9)  }
  0x15   : > { %3993 = vmatpush3.bf16.msra.mxu0 (!%p290_p9), %v4350_v4  ;;  %782 = vmatprep.subr.bf16.mxu1 (!%p290_p9), %v4363_v23  ;;  %v4374_v28 = vld [vmem:[%s5866_s4 + $0x34] ss:$20 sps:$4 sm:$0xff] (!%p290_p9)   ;;  %v4372_v30 = vld [vmem:[%s5866_s4 + $0x30] ss:$20 sps:$4 sm:$0xff] (!%p290_p9)   ;;  %v4378_v34 = vld [vmem:[%s5866_s4 + $0x58] ss:$20 sps:$4 sm:$0xff] (!%p290_p9)  }
  0x16   : > { %s325_s23 = scalar_select %p324_p10, %s4844_s13, 1  ;;  %3994 = vmatprep.subr.bf16.mxu0 %v4351_v5  ;;  %783 = vmatpush1.bf16.msra.mxu1 %v4365_v24  ;;  %v4371_v29 = vld [vmem:[%s5866_s4 + $0x28] ss:$20 sps:$4 sm:$0xff]   ;;  %v4377_v33 = vld [vmem:[%s5866_s4 + $0x50] ss:$20 sps:$4 sm:$0xff]  }
  0x17   : > { %784 = vmatprep.subr.bf16.mxu1 %v4369_v27  ;;  %v4375_v31 = vld [vmem:[%s5866_s4 + $0x54] ss:$20 sps:$4 sm:$0xff]   ;;  %v4380_v32 = vld [vmem:[%s5866_s4 + $0x5c] ss:$20 sps:$4 sm:$0xff]   ;;  %v4386_v36 = vld [vmem:[%s5866_s4 + $0x84] ss:$20 sps:$4 sm:$0xff]  }
  0x18   : > { %s3605_s28 = sshll.u32 %s325_s23, 3  ;;  %v4381_v35 = vld [vmem:[%s5866_s4 + $0x7c] ss:$20 sps:$4 sm:$0xff]   ;;  %v4383_v37 = vld [vmem:[%s5866_s4 + $0x78] ss:$20 sps:$4 sm:$0xff]   ;;  %s5872_s23 = smov 32  }
  0x19   : > { %s327_s21 = scalar_lea.vmem %s5862_s0, %s3605_s28  ;;  %3995 = vmatpush3.bf16.msra.mxu0 %v4352_v7  ;;  %v4384_v38 = vld [vmem:[%s5866_s4 + $0x80] ss:$20 sps:$4 sm:$0xff]   ;;  %v4387_v45 = vld [vmem:[%s5866_s4 + $0xa4] ss:$20 sps:$4 sm:$0xff]   ;;  %v4390_v48 = vld [vmem:[%s5866_s4 + $0xa8] ss:$20 sps:$4 sm:$0xff]  }
  0x1a   : > { %v331_v6 = vld [vmem:[%s327_s21] sm:$0xff]  ;;  %3996 = vmatprep.subr.bf16.mxu0 %v4353_v8  ;;  %785 = vmatpush1.bf16.msra.mxu1 %v4371_v29  ;;  %v4395_v50 = vld [vmem:[%s5866_s4 + $0xc8] ss:$20 sps:$4 sm:$0xff]   ;;  %v4402_v56 = vld [vmem:[%s5866_s4 + $0xf8] ss:$20 sps:$4 sm:$0xff]   ;;  %s5879_s21 = smov 32  }
  0x1b   : > { %336 = vperm.xlu0 %4346, %v331_v6   ;;  %786 = vmatprep.subr.bf16.mxu1 %v4375_v31  ;;  %v4389_v46 = vld [vmem:[%s5866_s4 + $0xa0] ss:$20 sps:$4 sm:$0xff]   ;;  %v4396_v51 = vld [vmem:[%s5866_s4 + $0xd0] ss:$20 sps:$4 sm:$0xff]   ;;  %v4407_v59 = vld [vmem:[%s5866_s4 + $0x118] ss:$20 sps:$4 sm:$0xff]  }
  0x1c   : > { %v4392_v47 = vld [vmem:[%s5866_s4 + $0xac] ss:$20 sps:$4 sm:$0xff]   ;;  %v4398_v52 = vld [vmem:[%s5866_s4 + $0xd4] ss:$20 sps:$4 sm:$0xff]   ;;  %v4404_v54 = vld [vmem:[%s5866_s4 + $0xfc] ss:$20 sps:$4 sm:$0xff]  }
  0x1d   : > { %3997 = vmatpush3.bf16.msra.mxu0 %v4354_v9  ;;  %v4393_v49 = vld [vmem:[%s5866_s4 + $0xcc] ss:$20 sps:$4 sm:$0xff]   ;;  %v4399_v53 = vld [vmem:[%s5866_s4 + $0xf4] ss:$20 sps:$4 sm:$0xff]   ;;  %v4401_v55 = vld [vmem:[%s5866_s4 + $0xf0] ss:$20 sps:$4 sm:$0xff]  }
  0x1e   : > { %3998 = vmatprep.subr.bf16.mxu0 %v4355_v10  ;;  %787 = vmatpush1.bf16.msra.mxu1 %v4377_v33  ;;  %v4405_v57 = vld [vmem:[%s5866_s4 + $0x11c] ss:$20 sps:$4 sm:$0xff]   ;;  %v4410_v58 = vld [vmem:[%s5866_s4 + $0x124] ss:$20 sps:$4 sm:$0xff]   ;;  %v4408_v60 = vld [vmem:[%s5866_s4 + $0x120] ss:$20 sps:$4 sm:$0xff]  }
  0x1f   : > { %788 = vmatprep.subr.bf16.mxu1 %v4381_v35  ;;  %v4411_v4 = vld [vmem:[%s5866_s4 + $0x10] ss:$20 sps:$4 sm:$0xff]   ;;  %v4412_v6 = vld [vmem:[%s5866_s4 + $0x38] ss:$20 sps:$4 sm:$0xff]   ;;  %v4413_v7 = vld [vmem:[%s5866_s4 + $0x60] ss:$20 sps:$4 sm:$0xff]  }
  0x20   : > { %v4414_v8 = vld [vmem:[%s5866_s4 + $0x88] ss:$20 sps:$4 sm:$0xff]   ;;  %v4415_v9 = vld [vmem:[%s5866_s4 + $0xb0] ss:$20 sps:$4 sm:$0xff]   ;;  %v4416_v10 = vld [vmem:[%s5866_s4 + $0xd8] ss:$20 sps:$4 sm:$0xff]  }
  0x21   : > { %3999 = vmatpush3.bf16.msra.mxu0 %v4356_v11  ;;  %v4417_v11 = vld [vmem:[%s5866_s4 + $0x100] ss:$20 sps:$4 sm:$0xff]   ;;  %s321_s18 = sand.u32 1, %s4755_s10  }
  0x22   : > { %4000 = vmatprep.subr.bf16.mxu0 %v4357_v12  ;;  %789 = vmatpush1.bf16.msra.mxu1 %v4383_v37  ;;  %v4418_v12 = vld [vmem:[%s5866_s4 + $0x128] ss:$20 sps:$4 sm:$0xff]   ;;  %s3604_s29 = sshll.u32 %s321_s18, 4  ;;  %s3527_s17 = scalar_lea.sflag [#allocation3], %s321_s18 }
  0x23   : > { %790 = vmatprep.subr.bf16.mxu1 %v4387_v45 }
  0x25   : > { %4001 = vmatpush3.bf16.msra.mxu0 %v4358_v13  ;;  %v5076_v13 = vld [vmem:[%s5864_s2] sm:$0xff] }
  0x26   : > { %4002 = vmatprep.subr.bf16.mxu0 %v4359_v14  ;;  %791 = vmatpush1.bf16.msra.mxu1 %v4389_v46  ;;  %v5081_v14 = vld [vmem:[%s5865_s3] sm:$0xff] }
  0x27   : > { %792 = vmatprep.subr.bf16.mxu1 %v4393_v49 }
  0x29   : > { %4003 = vmatpush3.bf16.msra.mxu0 %v4360_v15 }
  0x2a   : > { %4004 = vmatprep.subr.bf16.mxu0 %v4361_v16  ;;  %793 = vmatpush1.bf16.msra.mxu1 %v4395_v50 }
  0x2b   : > { %794 = vmatprep.subr.bf16.mxu1 %v4399_v53 }
  0x2d   : > { %4005 = vmatpush3.bf16.msra.mxu0 %v4362_v17 }
  0x2e   : > { %823 = vmatprep.subr.bf16.mxu0 %v4368_v26  ;;  %795 = vmatpush1.bf16.msra.mxu1 %v4401_v55 }
  0x2f   : > { %796 = vmatprep.subr.bf16.mxu1 %v4405_v57 }
  0x32   : > { %797 = vmatpush1.bf16.msra.mxu1 %v4407_v59 }
  0x33   : > { %4124 = vmatprep.subr.bf16.mxu1 %v4767_v61 }
  0x9a   : > { %v337_v21 = vpop.permute.xlu0 %336 }
  0x9b   : > { %vm338_vm0 = vcmp.eq.s32.totalorder %v4927_v19, %v337_v21  ;;  %vm339_vm1 = vcmp.eq.s32.totalorder %v334_v20, %v337_v21 }
  0x9c   : > { %vm3626_vm2 = vmpackc.low %vm338_vm0, %vm338_vm0 }
  0x9d   : > { %vm3624_vm3 = vmpackc.low %vm339_vm1, %vm339_vm1 }
  0x9e   : > { %3625 = vmatprep.mubr.msk.bf16.mxu0 %vm3624_vm3, %v4766_v22 }
  0x9f   : > { %3627 = vmatmul.mubr.msk.bf16.vlgmr.msra.gmra.mrb[0].mxu0 %vm3626_vm2, %v4766_v22 }
  0xa0   : > { %855 = vmatprep.mubr.bf16.mxu0 %v4765_v0  ;;  %824 = vmatpush1.bf16.msra.mxu0 %v4366_v25 }
  0xa1   : > { %825 = vmatprep.subr.bf16.mxu0 %v4374_v28 }
  0xa4   : > { %826 = vmatpush1.bf16.msra.mxu0 %v4372_v30 }
  0xa5   : > { %827 = vmatprep.subr.bf16.mxu0 %v4380_v32 }
  0xa8   : > { %828 = vmatpush1.bf16.msra.mxu0 %v4378_v34 }
  0xa9   : > { %829 = vmatprep.subr.bf16.mxu0 %v4386_v36 }
  0xac   : > { %830 = vmatpush1.bf16.msra.mxu0 %v4384_v38 }
  0xad   : > { %831 = vmatprep.subr.bf16.mxu0 %v4392_v47 }
  0xb0   : > { %832 = vmatpush1.bf16.msra.mxu0 %v4390_v48 }
  0xb1   : > { %833 = vmatprep.subr.bf16.mxu0 %v4398_v52 }
  0xb4   : > { %834 = vmatpush1.bf16.msra.mxu0 %v4396_v51 }
  0xb5   : > { %835 = vmatprep.subr.bf16.mxu0 %v4404_v54 }
  0xb8   : > { %836 = vmatpush1.bf16.msra.mxu0 %v4402_v56 }
  0xb9   : > { %837 = vmatprep.subr.bf16.mxu0 %v4410_v58 }
  0xbc   : > { %838 = vmatpush1.bf16.msra.mxu0 %v4408_v60 }
  0xbd   : > { %4168 = vmatprep.subr.bf16.mxu0 %v4767_v61 }
 0x172   : > { %v4006_v39 = vpop.f32.mrb[0].mxu0 }
 0x173   : > { %v4007_v40 = vpop.f32.mrb[1].mxu0 }
 0x174   : > { %v4980_v41 = vadd.f32 %v4007_v40, %v4006_v39  ;;  %v4009_v42 = vpop.f32.mrb[2].mxu0  ;;  %v515_v40 = vshrl.u32 %v332_v18, 7 }
 0x175   : > { %v4010_v43 = vpop.f32.mrb[3].mxu0 }
 0x176   : > { %v517_v44 = vmul.f32 %v4980_v41, %v4980_v41  ;;  %vm5100_vm7 = vcmp.ge.s32.totalorder %v515_v40, %v4927_v19 }
 0x178   : > { %518 = vadd.xlane.f32.xlu0 %v517_v44 }
 0x205   : > { %v519_v62 = vpop.xlane.xlu0 %518 }
 0x206   : > { %v521_v63 = vmul.f32 0.0078125, %v519_v62 }
 0x208   : > { %v522_v1 = vadd.f32 1e-05, %v521_v63 }
 0x20a   : > { %4643 = vrsqrt.f32 %v522_v1 }
 0x214   : > { %v4644_v2 = vpop.eup %4643 }
 0x215   : > { %v524_v3 = vmul.f32 %v4644_v2, %v4980_v41 }
 0x217   : > { %v525_v5 = vpack.c.bf16 %v524_v3, %v524_v3 }
 0x219   : > { %815 = vmatmul.mubr.bf16.vlgmr.msra.gmra.mrb[0].mxu1 %v525_v5  ;;  %856 = vmatmul.mubr.bf16.vlgmr.msra.gmra.mrb[4].mxu0 %v525_v5 }
 0x21a   : > { %4125 = vmatpush3.bf16.msra.mxu1 %v4411_v4  ;;  %4140 = vmatprep.mubr.msk.bf16.mxu1 %vm4768_vm4, %v4767_v61 }
 0x21b   : > { %4126 = vmatprep.subr.bf16.mxu1 %v4767_v61  ;;  %4170 = vmatprep.mubr.msk.bf16.mxu0 %vm4768_vm4, %v4767_v61 }
 0x21e   : > { %4127 = vmatpush3.bf16.msra.mxu1 %v4412_v6 }
 0x21f   : > { %4128 = vmatprep.subr.bf16.mxu1 %v4767_v61 }
 0x222   : > { %4129 = vmatpush3.bf16.msra.mxu1 %v4413_v7 }
 0x223   : > { %4130 = vmatprep.subr.bf16.mxu1 %v4767_v61 }
 0x226   : > { %4131 = vmatpush3.bf16.msra.mxu1 %v4414_v8 }
 0x227   : > { %4132 = vmatprep.subr.bf16.mxu1 %v4767_v61 }
 0x22a   : > { %4133 = vmatpush3.bf16.msra.mxu1 %v4415_v9 }
 0x22b   : > { %4134 = vmatprep.subr.bf16.mxu1 %v4767_v61 }
 0x22e   : > { %4135 = vmatpush3.bf16.msra.mxu1 %v4416_v10 }
 0x22f   : > { %4136 = vmatprep.subr.bf16.mxu1 %v4767_v61 }
 0x232   : > { %4137 = vmatpush3.bf16.msra.mxu1 %v4417_v11 }
 0x233   : > { %4138 = vmatprep.subr.bf16.mxu1 %v4767_v61 }
 0x236   : > { %4139 = vmatpush3.bf16.msra.mxu1 %v4418_v12 }
 0x237   : > { %4144 = vmatprep.subr.bf16.mxu1 %v4767_v61 }
 0x239   : > { %4141 = vmatmul.mubr.bf16.vlgmr.msra.gmra.mrb[4].mxu1 %v525_v5 }
 0x23a   : > { %4146 = vmatprep.mubr.msk.bf16.mxu1 %vm4768_vm4, %v4767_v61 }
 0x2ec   : > { %v816_v15 = vpop.f32.mrb[0].mxu1  ;;  %v857_v16 = vpop.f32.mrb[4].mxu0 }
 0x2ed   : > { %v904_v17 = vmul.f32 %v816_v15, %v5076_v13  ;;  %v907_v20 = vmul.f32 %v857_v16, %v5076_v13  ;;  %v818_v21 = vpop.f32.mrb[1].mxu1  ;;  %v859_v22 = vpop.f32.mrb[5].mxu0 }
 0x2ee   : > { %v905_v23 = vmul.f32 %v818_v21, %v5081_v14  ;;  %v908_v24 = vmul.f32 %v859_v22, %v5081_v14  ;;  %v820_v25 = vpop.f32.mrb[2].mxu1  ;;  %v861_v26 = vpop.f32.mrb[6].mxu0 }
 0x2ef   : > { %v821_v27 = vpop.f32.mrb[3].mxu1  ;;  %v862_v28 = vpop.f32.mrb[7].mxu0 }
 0x2f0   : > { %v906_v29 = vadd.f32 %v905_v23, %v904_v17  ;;  %v909_v30 = vadd.f32 %v908_v24, %v907_v20 }
 0x2f2   : > { %v911_v31 = vpack.c.bf16 %v909_v30, %v909_v30  ;;  %v910_v33 = vpack.c.bf16 %v906_v29, %v906_v29 }
 0x2f4   : > { %1248 = vrot.lane.b32.xlu0 %v911_v31, %s5872_s23  ;;  %v918_v32 = vsel %vm913_vm5, %v911_v31, 0 }
 0x2f5   : > { %4145 = vmatpush3.bf16.xpose.msra.mxu1 %v918_v32 }
 0x2f6   : > { %4150 = vmatprep.subr.bf16.mxu1 %v4767_v61 }
 0x2fc   : > { %4147 = vmatmul.mubr.msk.bf16.vlgmr.msra.gmra.mrb[8].mxu1 %vm913_vm5, %v910_v33 }
 0x2fd   : > { %4152 = vmatprep.mubr.msk.bf16.mxu1 %vm4768_vm4, %v4767_v61 }
 0x30c   : > { %v898_v34 = vpop.f32.mrb[4].mxu1 }
 0x30d   : > { %v5093_v35 = vpack.c.bf16 %v898_v34, %v898_v34  ;;  %v4142_v36 = vpop.f32.mrb[5].mxu1 }
 0x30e   : > { %v901_v37 = vpop.f32.mrb[6].mxu1 }
 0x30f   : > { %v4143_v38 = vpop.f32.mrb[7].mxu1  ;;  %v979_v39 = vsel %vm977_vm6, %v5093_v35, 0 }
 0x310   : > { %4151 = vmatpush3.bf16.msra.mxu1 %v979_v39 }
 0x311   : > { %4156 = vmatprep.subr.bf16.mxu1 %v4767_v61 }
 0x366   : > { %v1249_v59 = vpop.permute.xlu0 %1248 }
 0x367   : > { %v1254_v1 = vsel %vm913_vm5, %v1249_v59, 0 }
 0x3cf   : > { %v954_v43 = vpop.f32.mrb[8].mxu1 }
 0x3d0   : > { %v960_v44 = vsel %vm5100_vm7, %v954_v43, -1e+30  ;;  %v4148_v45 = vpop.f32.mrb[9].mxu1 }
 0x3d1   : > { %v957_v46 = vpop.f32.mrb[10].mxu1  ;;  %v962_v47 = vsel %vm961_vm8, %v960_v44, -inf }
 0x3d2   : > { %963 = vmax.xlane.f32.xlu1 %v962_v47  ;;  %v4149_v48 = vpop.f32.mrb[11].mxu1 }
 0x3e3   : > { %1025 = vrot.lane.b32.xlu1 %v911_v31, %s4770_s26 }
 0x45f   : > { %v964_v18 = vpop.xlane.xlu1 %963 }
 0x460   : > { %v965_v49 = vsub.f32 %v960_v44, %v964_v18 }
 0x462   : > { %v966_v19 = vmul.f32 1.442695, %v965_v49 }
 0x463   : > { %v1026_v52 = vpop.permute.xlu1 %1025 }
 0x464   : > { %4645 = vpow2.f32 %v966_v19  ;;  %v1031_v62 = vsel %vm913_vm5, %v1026_v52, 0 }
 0x46e   : > { %v4646_v50 = vpop.eup %4645 }
 0x46f   : > { %v968_v51 = vsel %vm961_vm8, %v4646_v50, 0.0 }
 0x470   : > { %969 = vadd.xlane.f32.xlu1 %v968_v51 }
 0x481   : > { %1022 = vrot.lane.b32.xlu1 %v910_v33, %s4770_s26 }
 0x485   : > { %1137 = vrot.lane.b32.xlu1 %v911_v31, %s4771_s27 }
 0x489   : > { %1135 = vrot.lane.b32.xlu1 %v910_v33, %s4771_s27 }
 0x48d   : > { %1246 = vrot.lane.b32.xlu1 %v910_v33, %s5872_s23 }
 0x4fd   : > { %v970_v53 = vpop.xlane.xlu1 %969 }
 0x4fe   : > { %4647 = vrcp.f32 %v970_v53 }
 0x501   : > { %v1023_v54 = vpop.permute.xlu1 %1022 }
 0x505   : > { %v1138_v55 = vpop.permute.xlu1 %1137 }
 0x506   : > { %v1143_v56 = vsel %vm913_vm5, %v1138_v55, 0 }
 0x507   : > { %4169 = vmatpush3.bf16.xpose.msra.mxu0 %v1143_v56 }
 0x508   : > { %v4648_v57 = vpop.eup %4647  ;;  %4180 = vmatprep.subr.bf16.mxu0 %v4767_v61 }
 0x509   : > { %v972_v58 = vmul.f32 %v4648_v57, %v4646_v50  ;;  %v1136_v63 = vpop.permute.xlu1 %1135 }
 0x50b   : > { %v973_v60 = vpack.c.bf16 %v972_v58, %v972_v58 }
 0x50d   : > { %4153 = vmatmul.mubr.msk.bf16.vlgmr.msra.gmra.mrb[12].mxu1 %vm961_vm8, %v973_v60  ;;  %v1247_v2 = vpop.permute.xlu1 %1246 }
 0x50e   : > { %4157 = vmatpush3.bf16.xpose.msra.mxu1 %v1031_v62  ;;  %4171 = vmatmul.mubr.msk.bf16.vlgmr.msra.gmra.mrb[8].mxu0 %vm913_vm5, %v1136_v63  ;;  %v4419_v63 = vld [vmem:[%s5867_s5] sm:$0xff]  }
 0x50f   : > { %4181 = vmatpush3.bf16.xpose.msra.mxu0 %v1254_v1  ;;  %4158 = vmatprep.mubr.msk.bf16.mxu1 %vm4768_vm4, %v4767_v61  ;;  %v4420_v1 = vld [vmem:[%s5867_s5 + $0x8] sm:$0xff]  }
 0x510   : > { %4182 = vmatprep.mubr.msk.bf16.mxu0 %vm4768_vm4, %v4767_v61  ;;  %4162 = vmatprep.subr.bf16.mxu1 %v4767_v61 }
 0x511   : > { %4192 = vmatprep.subr.bf16.mxu0 %v4767_v61 }
 0x515   : > { %4159 = vmatmul.mubr.msk.bf16.vlgmr.msra.gmra.mrb[16].mxu1 %vm913_vm5, %v1023_v54 }
 0x516   : > { %4183 = vmatmul.mubr.msk.bf16.vlgmr.msra.gmra.mrb[12].mxu0 %vm913_vm5, %v1247_v2  ;;  %4164 = vmatprep.mubr.msk.bf16.mxu1 %vm4768_vm4, %v4767_v61  ;;  %v4421_v2 = vld [vmem:[%s5867_s5 + $0x10] sm:$0xff]  }
 0x517   : > { %4208 = vmatprep.mubr.msk.bf16.mxu0 %vm4768_vm4, %v4767_v61  ;;  %4193 = vmatpush3.bf16.msra.mxu0 %v4419_v63  ;;  %v4463_v63 = vld [vmem:[%s5868_s6 + $0xc0] ss:$16 sps:$4 sm:$0xff]  }
 0x518   : > { %4194 = vmatprep.subr.bf16.mxu0 %v4767_v61 }
 0x51b   : > { %4195 = vmatpush3.bf16.msra.mxu0 %v4420_v1  ;;  %v4466_v1 = vld [vmem:[%s5868_s6 + $0xc8] ss:$16 sps:$4 sm:$0xff]  }
 0x51c   : > { %4196 = vmatprep.subr.bf16.mxu0 %v4767_v61 }
 0x51f   : > { %4197 = vmatpush3.bf16.msra.mxu0 %v4421_v2  ;;  %v4471_v2 = vld [vmem:[%s5868_s6 + $0xe4] ss:$16 sps:$4 sm:$0xff]  }
 0x520   : > { %4198 = vmatprep.subr.bf16.mxu0 %v4767_v61 }
 0x5e0   : > { %v5131_v3 = vpop.f32.mrb[12].mxu1 }
 0x5e1   : > { %v4154_v4 = vpop.f32.mrb[13].mxu1  ;;  %v1179_v5 = vpop.f32.mrb[8].mxu0 }
 0x5e2   : > { %v1185_v6 = vsel %vm5100_vm7, %v1179_v5, -1e+30  ;;  %v1018_v7 = vpop.f32.mrb[14].mxu1  ;;  %v4172_v8 = vpop.f32.mrb[9].mxu0  ;;  %v4422_v4 = vld [vmem:[%s5867_s5 + $0x18] sm:$0xff]   ;;  %v4423_v5 = vld [vmem:[%s5867_s5 + $0x20] sm:$0xff]  }
 0x5e3   : > { %v4155_v9 = vpop.f32.mrb[15].mxu1  ;;  %v1182_v10 = vpop.f32.mrb[10].mxu0  ;;  %v1186_v11 = vsel %vm961_vm8, %v1185_v6, -inf  ;;  %4199 = vmatpush3.bf16.msra.mxu0 %v4422_v4  ;;  %v4425_v7 = vld [vmem:[%s5867_s5 + $0x30] sm:$0xff]   ;;  %v4474_v4 = vld [vmem:[%s5868_s6 + $0xec] ss:$16 sps:$4 sm:$0xff]  }
 0x5e4   : > { %1187 = vmax.xlane.f32.xlu0 %v1186_v11  ;;  %v4173_v12 = vpop.f32.mrb[11].mxu0  ;;  %4200 = vmatprep.subr.bf16.mxu0 %v4767_v61 }
 0x5e5   : > { %v4426_v12 = vld [vmem:[%s5867_s5 + $0x38] sm:$0xff]  }
 0x5e7   : > { %4201 = vmatpush3.bf16.msra.mxu0 %v4423_v5  ;;  %v4469_v5 = vld [vmem:[%s5868_s6 + $0xe0] ss:$16 sps:$4 sm:$0xff]  }
 0x5e8   : > { %v1067_v15 = vpop.f32.mrb[16].mxu1  ;;  %4202 = vmatprep.subr.bf16.mxu0 %v4767_v61 }
 0x5e9   : > { %v1073_v16 = vsel %vm5100_vm7, %v1067_v15, -1e+30  ;;  %v4160_v17 = vpop.f32.mrb[17].mxu1  ;;  %v1290_v20 = vpop.f32.mrb[12].mxu0 }
 0x5ea   : > { %v1070_v21 = vpop.f32.mrb[18].mxu1  ;;  %v4184_v22 = vpop.f32.mrb[13].mxu0  ;;  %v1074_v23 = vsel %vm961_vm8, %v1073_v16, -inf  ;;  %v1296_v24 = vsel %vm5100_vm7, %v1290_v20, -1e+30 }
 0x5eb   : > { %v1293_v25 = vpop.f32.mrb[14].mxu0  ;;  %1075 = vmax.xlane.f32.xlu1 %v1074_v23  ;;  %v4161_v26 = vpop.f32.mrb[19].mxu1  ;;  %v1297_v28 = vsel %vm961_vm8, %v1296_v24, -inf }
 0x5ec   : > { %v4185_v27 = vpop.f32.mrb[15].mxu0 }
 0x5ef   : > { %1298 = vmax.xlane.f32.xlu1 %v1297_v28 }
 0x671   : > { %v1188_v29 = vpop.xlane.xlu0 %1187 }
 0x672   : > { %v1189_v30 = vsub.f32 %v1185_v6, %v1188_v29  ;;  %v4424_v6 = vld [vmem:[%s5867_s5 + $0x28] sm:$0xff]  }
 0x673   : > { %4203 = vmatpush3.bf16.msra.mxu0 %v4424_v6  ;;  %v4472_v6 = vld [vmem:[%s5868_s6 + $0xe8] ss:$16 sps:$4 sm:$0xff]  }
 0x674   : > { %v1190_v31 = vmul.f32 1.442695, %v1189_v30  ;;  %4204 = vmatprep.subr.bf16.mxu0 %v4767_v61 }
 0x676   : > { %4649 = vpow2.f32 %v1190_v31 }
 0x677   : > { %4205 = vmatpush3.bf16.msra.mxu0 %v4425_v7 }
 0x678   : > { %v1076_v32 = vpop.xlane.xlu1 %1075  ;;  %4206 = vmatprep.subr.bf16.mxu0 %v4767_v61 }
 0x679   : > { %v1077_v33 = vsub.f32 %v1073_v16, %v1076_v32  ;;  %v4427_v32 = vld [vmem:[%s5868_s6] ss:$16 sps:$4 sm:$0xff]  }
 0x67b   : > { %v1078_v34 = vmul.f32 1.442695, %v1077_v33  ;;  %4207 = vmatpush3.bf16.msra.mxu0 %v4426_v12  ;;  %v4429_v33 = vld [vmem:[%s5868_s6 + $0x4] ss:$16 sps:$4 sm:$0xff]  }
 0x67c   : > { %v1299_v36 = vpop.xlane.xlu1 %1298 }
 0x67d   : > { %4651 = vpow2.f32 %v1078_v34  ;;  %v1300_v37 = vsub.f32 %v1296_v24, %v1299_v36  ;;  %v4432_v34 = vld [vmem:[%s5868_s6 + $0xc] ss:$16 sps:$4 sm:$0xff]   ;;  %v4435_v36 = vld [vmem:[%s5868_s6 + $0x24] ss:$16 sps:$4 sm:$0xff]  }
 0x67e   : > { %1721 = vmatprep.subr.bf16.mxu0 %v4432_v34 }
 0x67f   : > { %v1301_v38 = vmul.f32 1.442695, %v1300_v37  ;;  %v4438_v37 = vld [vmem:[%s5868_s6 + $0x2c] ss:$16 sps:$4 sm:$0xff]  }
 0x680   : > { %v4650_v39 = vpop.eup %4649 }
 0x681   : > { %4653 = vpow2.f32 %v1301_v38  ;;  %v1192_v40 = vsel %vm961_vm8, %v4650_v39, 0.0  ;;  %v4433_v38 = vld [vmem:[%s5868_s6 + $0x20] ss:$16 sps:$4 sm:$0xff]  }
 0x682   : > { %1193 = vadd.xlane.f32.xlu1 %v1192_v40  ;;  %v4441_v40 = vld [vmem:[%s5868_s6 + $0x44] ss:$16 sps:$4 sm:$0xff]  }
 0x687   : > { %v4652_v43 = vpop.eup %4651 }
 0x688   : > { %v1080_v44 = vsel %vm961_vm8, %v4652_v43, 0.0 }
 0x689   : > { %1081 = vadd.xlane.f32.xlu1 %v1080_v44  ;;  %v4439_v44 = vld [vmem:[%s5868_s6 + $0x40] ss:$16 sps:$4 sm:$0xff]  }
 0x68b   : > { %v4654_v45 = vpop.eup %4653 }
 0x68c   : > { %v1303_v46 = vsel %vm961_vm8, %v4654_v45, 0.0 }
 0x68d   : > { %1304 = vadd.xlane.f32.xlu0 %v1303_v46  ;;  %v4447_v46 = vld [vmem:[%s5868_s6 + $0x64] ss:$16 sps:$4 sm:$0xff]  }
 0x69a   : > { %1087 = vrot.lane.b32.xlu1 %v5093_v35, %s4770_s26 }
 0x69e   : > { %1309 = vrot.lane.b32.xlu1 %v5093_v35, %s5872_s23 }
 0x6a3   : > { %1198 = vrot.lane.b32.xlu0 %v5093_v35, %s4771_s27 }
 0x70f   : > { %v1194_v47 = vpop.xlane.xlu1 %1193 }
 0x716   : > { %v1082_v48 = vpop.xlane.xlu1 %1081 }
 0x717   : > { %4655 = vrcp.f32 %v1082_v48  ;;  %v4445_v48 = vld [vmem:[%s5868_s6 + $0x60] ss:$16 sps:$4 sm:$0xff]  }
 0x718   : > { %4657 = vrcp.f32 %v1194_v47  ;;  %v4450_v47 = vld [vmem:[%s5868_s6 + $0x6c] ss:$16 sps:$4 sm:$0xff]  }
 0x71a   : > { %v1088_v18 = vpop.permute.xlu1 %1087  ;;  %v1305_v19 = vpop.xlane.xlu0 %1304 }
 0x71b   : > { %v1093_v49 = vsel %vm977_vm6, %v1088_v18, 0  ;;  %4659 = vrcp.f32 %v1305_v19  ;;  %v4448_v18 = vld [vmem:[%s5868_s6 + $0x68] ss:$16 sps:$4 sm:$0xff]  }
 0x71c   : > { %4163 = vmatpush3.bf16.msra.mxu1 %v1093_v49 }
 0x71d   : > { %4174 = vmatprep.subr.bf16.mxu1 %v4767_v61 }
 0x71e   : > { %v1199_v52 = vpop.permute.xlu0 %1198  ;;  %v1310_v56 = vpop.permute.xlu1 %1309 }
 0x71f   : > { %v1204_v55 = vsel %vm977_vm6, %v1199_v52, 0  ;;  %v1315_v59 = vsel %vm977_vm6, %v1310_v56, 0  ;;  %v4459_v56 = vld [vmem:[%s5868_s6 + $0xa4] ss:$16 sps:$4 sm:$0xff]  }
 0x721   : > { %v4656_v50 = vpop.eup %4655 }
 0x722   : > { %v1084_v51 = vmul.f32 %v4656_v50, %v4652_v43  ;;  %v4658_v54 = vpop.eup %4657  ;;  %v4444_v43 = vld [vmem:[%s5868_s6 + $0x4c] ss:$16 sps:$4 sm:$0xff]  }
 0x723   : > { %v1196_v35 = vmul.f32 %v4658_v54, %v4650_v39  ;;  %v4436_v39 = vld [vmem:[%s5868_s6 + $0x28] ss:$16 sps:$4 sm:$0xff]   ;;  %v4453_v54 = vld [vmem:[%s5868_s6 + $0x84] ss:$16 sps:$4 sm:$0xff]  }
 0x724   : > { %v1085_v53 = vpack.c.bf16 %v1084_v51, %v1084_v51 }
 0x725   : > { %v1197_v57 = vpack.c.bf16 %v1196_v35, %v1196_v35  ;;  %v4660_v58 = vpop.eup %4659  ;;  %v4454_v35 = vld [vmem:[%s5868_s6 + $0x88] ss:$16 sps:$4 sm:$0xff]  }
 0x726   : > { %4165 = vmatmul.mubr.msk.bf16.vlgmr.msra.gmra.mrb[20].mxu1 %vm961_vm8, %v1085_v53  ;;  %v1307_v60 = vmul.f32 %v4660_v58, %v4654_v45  ;;  %v4442_v45 = vld [vmem:[%s5868_s6 + $0x48] ss:$16 sps:$4 sm:$0xff]  }
 0x727   : > { %4175 = vmatpush3.bf16.msra.mxu1 %v1204_v55  ;;  %4176 = vmatprep.mubr.msk.bf16.mxu1 %vm4768_vm4, %v4767_v61  ;;  %v4456_v55 = vld [vmem:[%s5868_s6 + $0x8c] ss:$16 sps:$4 sm:$0xff]   ;;  %v4460_v58 = vld [vmem:[%s5868_s6 + $0xa8] ss:$16 sps:$4 sm:$0xff]  }
 0x728   : > { %4186 = vmatprep.subr.bf16.mxu1 %v4767_v61  ;;  %v1308_v62 = vpack.c.bf16 %v1307_v60, %v1307_v60  ;;  %v4465_v60 = vld [vmem:[%s5868_s6 + $0xc4] ss:$16 sps:$4 sm:$0xff]  }
 0x72e   : > { %4177 = vmatmul.mubr.msk.bf16.vlgmr.msra.gmra.mrb[24].mxu1 %vm961_vm8, %v1197_v57  ;;  %v4457_v57 = vld [vmem:[%s5868_s6 + $0xa0] ss:$16 sps:$4 sm:$0xff]  }
 0x72f   : > { %4187 = vmatpush3.bf16.msra.mxu1 %v1315_v59  ;;  %4188 = vmatprep.mubr.msk.bf16.mxu1 %vm4768_vm4, %v4767_v61  ;;  %v4462_v59 = vld [vmem:[%s5868_s6 + $0xac] ss:$16 sps:$4 sm:$0xff]  }
 0x730   : > { %1680 = vmatprep.subr.bf16.mxu1 %v4429_v33 }
 0x736   : > { %4189 = vmatmul.mubr.msk.bf16.vlgmr.msra.gmra.mrb[28].mxu1 %vm961_vm8, %v1308_v62  ;;  %v4468_v62 = vld [vmem:[%s5868_s6 + $0xcc] ss:$16 sps:$4 sm:$0xff]  }
 0x737   : > { %1712 = vmatprep.mubr.bf16.mxu1 %v4765_v0  ;;  %1681 = vmatpush1.bf16.msra.mxu1 %v4427_v32  ;;  %v4490_v32 = vld [vmem:[%s5869_s7 + $0x38] sm:$0xff]  }
 0x738   : > { %1682 = vmatprep.subr.bf16.mxu1 %v4435_v36 }
 0x73b   : > { %1683 = vmatpush1.bf16.msra.mxu1 %v4433_v38 }
 0x73c   : > { %1684 = vmatprep.subr.bf16.mxu1 %v4441_v40 }
 0x73f   : > { %1685 = vmatpush1.bf16.msra.mxu1 %v4439_v44 }
 0x740   : > { %1686 = vmatprep.subr.bf16.mxu1 %v4447_v46 }
 0x743   : > { %1687 = vmatpush1.bf16.msra.mxu1 %v4445_v48 }
 0x744   : > { %1688 = vmatprep.subr.bf16.mxu1 %v4453_v54 }
 0x7f9   : > { %v1129_v8 = vpop.f32.mrb[20].mxu1 }
 0x7fa   : > { %1358 = vrot.lane.b32.xlu1 %v1129_v8, %s5872_s23  ;;  %v4166_v9 = vpop.f32.mrb[21].mxu1 }
 0x7fb   : > { %v1132_v10 = vpop.f32.mrb[22].mxu1 }
 0x7fc   : > { %v4167_v11 = vpop.f32.mrb[23].mxu1 }
 0x801   : > { %v1240_v15 = vpop.f32.mrb[24].mxu1 }
 0x802   : > { %1362 = vrot.lane.b32.xlu0 %v1240_v15, %s4771_s27  ;;  %v4178_v16 = vpop.f32.mrb[25].mxu1  ;;  %v4475_v15 = vld [vmem:[%s5869_s7 + $0x40] sm:$0xff]  }
 0x803   : > { %v1243_v17 = vpop.f32.mrb[26].mxu1  ;;  %v4476_v16 = vld [vmem:[%s5869_s7] sm:$0xff]  }
 0x804   : > { %v4179_v20 = vpop.f32.mrb[27].mxu1  ;;  %v4477_v17 = vld [vmem:[%s5869_s7 + $0x48] sm:$0xff]  }
 0x805   : > { %v4478_v20 = vld [vmem:[%s5869_s7 + $0x8] sm:$0xff]  }
 0x809   : > { %v1351_v21 = vpop.f32.mrb[28].mxu1 }
 0x80a   : > { %1366 = vrot.lane.b32.xlu1 %v1351_v21, %s4770_s26  ;;  %v4190_v22 = vpop.f32.mrb[29].mxu1  ;;  %v4479_v21 = vld [vmem:[%s5869_s7 + $0x50] sm:$0xff]  }
 0x80b   : > { %v1354_v23 = vpop.f32.mrb[30].mxu1  ;;  %v4480_v22 = vld [vmem:[%s5869_s7 + $0x10] sm:$0xff]  }
 0x80c   : > { %v4191_v24 = vpop.f32.mrb[31].mxu1  ;;  %v4481_v23 = vld [vmem:[%s5869_s7 + $0x58] sm:$0xff]  }
 0x80d   : > { %v4482_v24 = vld [vmem:[%s5869_s7 + $0x18] sm:$0xff]  }
 0x86c   : > { %v1359_v25 = vpop.permute.xlu1 %1358 }
 0x86d   : > { %v1369_v27 = vsel %vm913_vm5, %v5131_v3, %v1359_v25  ;;  %v4430_v3 = vld [vmem:[%s5868_s6 + $0x8] ss:$16 sps:$4 sm:$0xff]   ;;  %v4483_v25 = vld [vmem:[%s5869_s7 + $0x60] sm:$0xff]  }
 0x874   : > { %v1363_v26 = vpop.permute.xlu0 %1362 }
 0x875   : > { %v1371_v28 = vsel %vm1370_vm9, %v1369_v27, %v1363_v26  ;;  %v4484_v26 = vld [vmem:[%s5869_s7 + $0x20] sm:$0xff]   ;;  %v4485_v27 = vld [vmem:[%s5869_s7 + $0x68] sm:$0xff]  }
 0x87c   : > { %v1367_v29 = vpop.permute.xlu1 %1366 }
 0x87d   : > { %v1373_v30 = vsel %vm1372_vm10, %v1371_v28, %v1367_v29  ;;  %v4486_v28 = vld [vmem:[%s5869_s7 + $0x28] sm:$0xff]   ;;  %v4487_v29 = vld [vmem:[%s5869_s7 + $0x70] sm:$0xff]  }
 0x87e   : > { %v1374_v31 = vpack.c.bf16 %v1373_v30, %v1373_v30  ;;  %v4488_v30 = vld [vmem:[%s5869_s7 + $0x30] sm:$0xff]  }
 0x880   : > { %4209 = vmatmul.mubr.bf16.vlgmr.msra.gmra.mrb[16].mxu0 %v1374_v31  ;;  %v4489_v31 = vld [vmem:[%s5869_s7 + $0x78] sm:$0xff]  }
 0x881   : > { %1753 = vmatprep.mubr.bf16.mxu0 %v4765_v0  ;;  %1722 = vmatpush1.bf16.msra.mxu0 %v4430_v3 }
 0x882   : > { %1723 = vmatprep.subr.bf16.mxu0 %v4438_v37 }
 0x885   : > { %1724 = vmatpush1.bf16.msra.mxu0 %v4436_v39 }
 0x886   : > { %1725 = vmatprep.subr.bf16.mxu0 %v4444_v43 }
 0x889   : > { %1726 = vmatpush1.bf16.msra.mxu0 %v4442_v45 }
 0x88a   : > { %1727 = vmatprep.subr.bf16.mxu0 %v4450_v47 }
 0x88d   : > { %1728 = vmatpush1.bf16.msra.mxu0 %v4448_v18 }
 0x88e   : > { %1729 = vmatprep.subr.bf16.mxu0 %v4456_v55 }
 0x891   : > { %1730 = vmatpush1.bf16.msra.mxu0 %v4454_v35  ;;  %v4493_v35 = vld [vmem:[%s5866_s4 + $0x144] ss:$20 sps:$4 sm:$0xff]  }
 0x892   : > { %1731 = vmatprep.subr.bf16.mxu0 %v4462_v59  ;;  %v4502_v59 = vld [vmem:[%s5866_s4 + $0x174] ss:$20 sps:$4 sm:$0xff]  }
 0x895   : > { %1732 = vmatpush1.bf16.msra.mxu0 %v4460_v58  ;;  %v4499_v58 = vld [vmem:[%s5866_s4 + $0x16c] ss:$20 sps:$4 sm:$0xff]  }
 0x896   : > { %1733 = vmatprep.subr.bf16.mxu0 %v4468_v62  ;;  %v4500_v62 = vld [vmem:[%s5866_s4 + $0x170] ss:$20 sps:$4 sm:$0xff]  }
 0x899   : > { %1734 = vmatpush1.bf16.msra.mxu0 %v4466_v1  ;;  %v4508_v1 = vld [vmem:[%s5866_s4 + $0x19c] ss:$20 sps:$4 sm:$0xff]  }
 0x89a   : > { %1735 = vmatprep.subr.bf16.mxu0 %v4474_v4  ;;  %v4506_v4 = vld [vmem:[%s5866_s4 + $0x198] ss:$20 sps:$4 sm:$0xff]  }
 0x89d   : > { %1736 = vmatpush1.bf16.msra.mxu0 %v4472_v6  ;;  %v4514_v6 = vld [vmem:[%s5866_s4 + $0x1c4] ss:$20 sps:$4 sm:$0xff]  }
 0x89e   : > { %2214 = vmatprep.subr.bf16.mxu0 %v4493_v35 }
 0x953   : > { %v1473_v49 = vpop.f32.mrb[16].mxu0 }
 0x954   : > { %v5252_v19 = vadd.f32 %v4980_v41, %v1473_v49  ;;  %v4210_v50 = vpop.f32.mrb[17].mxu0  ;;  %v4451_v41 = vld [vmem:[%s5868_s6 + $0x80] ss:$16 sps:$4 sm:$0xff]  }
 0x955   : > { %v1476_v51 = vpop.f32.mrb[18].mxu0  ;;  %1689 = vmatpush1.bf16.msra.mxu1 %v4451_v41  ;;  %v4491_v41 = vld [vmem:[%s5866_s4 + $0x140] ss:$20 sps:$4 sm:$0xff]  }
 0x956   : > { %v4211_v52 = vpop.f32.mrb[19].mxu0  ;;  %v1480_v53 = vmul.f32 %v5252_v19, %v5252_v19  ;;  %1690 = vmatprep.subr.bf16.mxu1 %v4459_v56  ;;  %v4494_v56 = vld [vmem:[%s5866_s4 + $0x148] ss:$20 sps:$4 sm:$0xff]  }
 0x958   : > { %1481 = vadd.xlane.f32.xlu0 %v1480_v53 }
 0x959   : > { %1691 = vmatpush1.bf16.msra.mxu1 %v4457_v57  ;;  %v4496_v57 = vld [vmem:[%s5866_s4 + $0x14c] ss:$20 sps:$4 sm:$0xff]  }
 0x95a   : > { %1692 = vmatprep.subr.bf16.mxu1 %v4465_v60  ;;  %v4497_v60 = vld [vmem:[%s5866_s4 + $0x168] ss:$20 sps:$4 sm:$0xff]  }
 0x95d   : > { %1693 = vmatpush1.bf16.msra.mxu1 %v4463_v63  ;;  %v4505_v63 = vld [vmem:[%s5866_s4 + $0x194] ss:$20 sps:$4 sm:$0xff]  }
 0x95e   : > { %1694 = vmatprep.subr.bf16.mxu1 %v4471_v2  ;;  %v4503_v2 = vld [vmem:[%s5866_s4 + $0x190] ss:$20 sps:$4 sm:$0xff]  }
 0x961   : > { %1695 = vmatpush1.bf16.msra.mxu1 %v4469_v5  ;;  %v4511_v5 = vld [vmem:[%s5866_s4 + $0x1bc] ss:$20 sps:$4 sm:$0xff]  }
 0x962   : > { %4046 = vmatprep.subr.bf16.mxu1 %v4475_v15 }
 0x9e5   : > { %v1482_v7 = vpop.xlane.xlu0 %1481 }
 0x9e6   : > { %v1483_v8 = vmul.f32 0.0078125, %v1482_v7  ;;  %v4509_v7 = vld [vmem:[%s5866_s4 + $0x1b8] ss:$20 sps:$4 sm:$0xff]  }
 0x9e8   : > { %v1484_v9 = vadd.f32 1e-05, %v1483_v8  ;;  %v4512_v8 = vld [vmem:[%s5866_s4 + $0x1c0] ss:$20 sps:$4 sm:$0xff]  }
 0x9ea   : > { %4661 = vrsqrt.f32 %v1484_v9 }
 0x9f4   : > { %v4662_v10 = vpop.eup %4661 }
 0x9f5   : > { %v1486_v11 = vmul.f32 %v4662_v10, %v5252_v19 }
 0x9f7   : > { %v1487_v12 = vpack.c.bf16 %v1486_v11, %v1486_v11 }
 0x9f9   : > { %1713 = vmatmul.mubr.bf16.vlgmr.msra.gmra.mrb[32].mxu1 %v1487_v12  ;;  %1754 = vmatmul.mubr.bf16.vlgmr.msra.gmra.mrb[20].mxu0 %v1487_v12 }
 0x9fa   : > { %2246 = vmatprep.mubr.bf16.mxu0 %v4765_v0  ;;  %4047 = vmatpush3.bf16.msra.mxu1 %v4476_v16 }
 0x9fb   : > { %4048 = vmatprep.subr.bf16.mxu1 %v4477_v17  ;;  %2215 = vmatpush1.bf16.msra.mxu0 %v4491_v41 }
 0x9fc   : > { %2216 = vmatprep.subr.bf16.mxu0 %v4499_v58 }
 0x9fe   : > { %4049 = vmatpush3.bf16.msra.mxu1 %v4478_v20  ;;  %v4517_v20 = vld [vmem:[%s5866_s4 + $0x1e4] ss:$20 sps:$4 sm:$0xff]  }
 0x9ff   : > { %4050 = vmatprep.subr.bf16.mxu1 %v4479_v21  ;;  %2217 = vmatpush1.bf16.msra.mxu0 %v4497_v60  ;;  %v4515_v21 = vld [vmem:[%s5866_s4 + $0x1e0] ss:$20 sps:$4 sm:$0xff]  }
 0xa00   : > { %2218 = vmatprep.subr.bf16.mxu0 %v4505_v63 }
 0xa02   : > { %4051 = vmatpush3.bf16.msra.mxu1 %v4480_v22  ;;  %v4520_v22 = vld [vmem:[%s5866_s4 + $0x1ec] ss:$20 sps:$4 sm:$0xff]  }
 0xa03   : > { %4052 = vmatprep.subr.bf16.mxu1 %v4481_v23  ;;  %2219 = vmatpush1.bf16.msra.mxu0 %v4503_v2  ;;  %v4521_v23 = vld [vmem:[%s5866_s4 + $0x208] ss:$20 sps:$4 sm:$0xff]  }
 0xa04   : > { %2220 = vmatprep.subr.bf16.mxu0 %v4511_v5 }
 0xa06   : > { %4053 = vmatpush3.bf16.msra.mxu1 %v4482_v24  ;;  %v4523_v24 = vld [vmem:[%s5866_s4 + $0x20c] ss:$20 sps:$4 sm:$0xff]  }
 0xa07   : > { %4054 = vmatprep.subr.bf16.mxu1 %v4483_v25  ;;  %2221 = vmatpush1.bf16.msra.mxu0 %v4509_v7  ;;  %v4524_v25 = vld [vmem:[%s5866_s4 + $0x210] ss:$20 sps:$4 sm:$0xff]  }
 0xa08   : > { %2222 = vmatprep.subr.bf16.mxu0 %v4517_v20 }
 0xa0a   : > { %4055 = vmatpush3.bf16.msra.mxu1 %v4484_v26  ;;  %v4526_v26 = vld [vmem:[%s5866_s4 + $0x214] ss:$20 sps:$4 sm:$0xff]  }
 0xa0b   : > { %4056 = vmatprep.subr.bf16.mxu1 %v4485_v27  ;;  %2223 = vmatpush1.bf16.msra.mxu0 %v4515_v21  ;;  %v4529_v27 = vld [vmem:[%s5866_s4 + $0x234] ss:$20 sps:$4 sm:$0xff]  }
 0xa0c   : > { %2224 = vmatprep.subr.bf16.mxu0 %v4523_v24 }
 0xa0e   : > { %4057 = vmatpush3.bf16.msra.mxu1 %v4486_v28  ;;  %v4532_v28 = vld [vmem:[%s5866_s4 + $0x23c] ss:$20 sps:$4 sm:$0xff]  }
 0xa0f   : > { %4058 = vmatprep.subr.bf16.mxu1 %v4487_v29  ;;  %2225 = vmatpush1.bf16.msra.mxu0 %v4521_v23  ;;  %v4527_v29 = vld [vmem:[%s5866_s4 + $0x230] ss:$20 sps:$4 sm:$0xff]  }
 0xa10   : > { %2226 = vmatprep.subr.bf16.mxu0 %v4529_v27 }
 0xa12   : > { %4059 = vmatpush3.bf16.msra.mxu1 %v4488_v30  ;;  %v4530_v30 = vld [vmem:[%s5866_s4 + $0x238] ss:$20 sps:$4 sm:$0xff]  }
 0xa13   : > { %4060 = vmatprep.subr.bf16.mxu1 %v4489_v31  ;;  %v4535_v31 = vld [vmem:[%s5866_s4 + $0x25c] ss:$20 sps:$4 sm:$0xff]   ;;  %2227 = vmatpush1.bf16.msra.mxu0 %v4527_v29 }
 0xa14   : > { %2228 = vmatprep.subr.bf16.mxu0 %v4535_v31 }
 0xa16   : > { %4061 = vmatpush3.bf16.msra.mxu1 %v4490_v32  ;;  %v4538_v32 = vld [vmem:[%s5866_s4 + $0x264] ss:$20 sps:$4 sm:$0xff]  }
 0xa17   : > { %2255 = vmatprep.subr.bf16.mxu1 %v4496_v57 }
 0xacc   : > { %v1714_v33 = vpop.f32.mrb[32].mxu1  ;;  %v1755_v3 = vpop.f32.mrb[20].mxu0 }
 0xacd   : > { %v3716_v34 = vmul.f32 -1.442695, %v1714_v33  ;;  %v1716_v36 = vpop.f32.mrb[33].mxu1  ;;  %v1757_v37 = vpop.f32.mrb[21].mxu0 }
 0xace   : > { %v3717_v38 = vmul.f32 -1.442695, %v1716_v36  ;;  %v1718_v39 = vpop.f32.mrb[34].mxu1  ;;  %v1759_v40 = vpop.f32.mrb[22].mxu0 }
 0xacf   : > { %4663 = vpow2.f32 %v3716_v34  ;;  %v1719_v43 = vpop.f32.mrb[35].mxu1  ;;  %v1760_v44 = vpop.f32.mrb[23].mxu0  ;;  %v4539_v40 = vld [vmem:[%s5866_s4 + $0x150] ss:$20 sps:$4 sm:$0xff]  }
 0xad0   : > { %4665 = vpow2.f32 %v3717_v38  ;;  %v4540_v44 = vld [vmem:[%s5866_s4 + $0x178] ss:$20 sps:$4 sm:$0xff]  }
 0xad9   : > { %v4664_v45 = vpop.eup %4663 }
 0xada   : > { %v4666_v46 = vpop.eup %4665  ;;  %v1768_v47 = vadd.f32 1.0, %v4664_v45  ;;  %v4541_v45 = vld [vmem:[%s5866_s4 + $0x1a0] ss:$20 sps:$4 sm:$0xff]  }
 0xadb   : > { %v1769_v48 = vadd.f32 1.0, %v4666_v46  ;;  %v4542_v46 = vld [vmem:[%s5866_s4 + $0x1c8] ss:$20 sps:$4 sm:$0xff]  }
 0xadc   : > { %4667 = vrcp.f32 %v1768_v47  ;;  %v4543_v47 = vld [vmem:[%s5866_s4 + $0x1f0] ss:$20 sps:$4 sm:$0xff]  }
 0xadd   : > { %4669 = vrcp.f32 %v1769_v48  ;;  %v4544_v48 = vld [vmem:[%s5866_s4 + $0x218] ss:$20 sps:$4 sm:$0xff]  }
 0xae6   : > { %v4668_v18 = vpop.eup %4667 }
 0xae7   : > { %v4670_v49 = vpop.eup %4669  ;;  %v1774_v50 = vmul.f32 %v4668_v18, %v1714_v33  ;;  %v4533_v33 = vld [vmem:[%s5866_s4 + $0x258] ss:$20 sps:$4 sm:$0xff]   ;;  %v4545_v18 = vld [vmem:[%s5866_s4 + $0x240] ss:$20 sps:$4 sm:$0xff]  }
 0xae8   : > { %v1775_v51 = vmul.f32 %v4670_v49, %v1716_v36  ;;  %2229 = vmatpush1.bf16.msra.mxu0 %v4533_v33  ;;  %v4546_v49 = vld [vmem:[%s5866_s4 + $0x268] ss:$20 sps:$4 sm:$0xff]  }
 0xae9   : > { %v1776_v52 = vmul.f32 %v1774_v50, %v1755_v3  ;;  %v4536_v3 = vld [vmem:[%s5866_s4 + $0x260] ss:$20 sps:$4 sm:$0xff]   ;;  %4212 = vmatprep.subr.bf16.mxu0 %v4767_v61 }
 0xaea   : > { %v1777_v53 = vmul.f32 %v1775_v51, %v1757_v37 }
 0xaeb   : > { %v1778_v55 = vpack.c.bf16 %v1776_v52, %v1776_v52 }
 0xaec   : > { %v1779_v54 = vpack.c.bf16 %v1777_v53, %v1777_v53 }
 0xaee   : > { %1940 = vmatprep.mubr.bf16.mxu1 %v1779_v54 }
 0xaef   : > { %1941 = vmatmul.mubr.bf16.vlgmr.msra.gmra.mrb[36].mxu1 %v1778_v55 }
 0xaf0   : > { %2287 = vmatprep.mubr.bf16.mxu1 %v4765_v0  ;;  %2256 = vmatpush1.bf16.msra.mxu1 %v4494_v56 }
 0xaf1   : > { %2257 = vmatprep.subr.bf16.mxu1 %v4502_v59 }
 0xaf4   : > { %2258 = vmatpush1.bf16.msra.mxu1 %v4500_v62 }
 0xaf5   : > { %2259 = vmatprep.subr.bf16.mxu1 %v4508_v1 }
 0xaf8   : > { %2260 = vmatpush1.bf16.msra.mxu1 %v4506_v4 }
 0xaf9   : > { %2261 = vmatprep.subr.bf16.mxu1 %v4514_v6 }
 0xafc   : > { %2262 = vmatpush1.bf16.msra.mxu1 %v4512_v8 }
 0xafd   : > { %2263 = vmatprep.subr.bf16.mxu1 %v4520_v22 }
 0xbc2   : > { %v4062_v9 = vpop.f32.mrb[36].mxu1 }
 0xbc3   : > { %v4063_v10 = vpop.f32.mrb[37].mxu1 }
 0xbc4   : > { %v4064_v11 = vadd.f32 %v4063_v10, %v4062_v9  ;;  %v4065_v12 = vpop.f32.mrb[38].mxu1 }
 0xbc5   : > { %v4066_v15 = vpop.f32.mrb[39].mxu1 }
 0xbc6   : > { %v5404_v16 = vadd.f32 %v4064_v11, %v5252_v19  ;;  %v4518_v19 = vld [vmem:[%s5866_s4 + $0x1e8] ss:$20 sps:$4 sm:$0xff]  }
 0xbc7   : > { %2264 = vmatpush1.bf16.msra.mxu1 %v4518_v19 }
 0xbc8   : > { %v1949_v17 = vmul.f32 %v5404_v16, %v5404_v16  ;;  %2265 = vmatprep.subr.bf16.mxu1 %v4526_v26 }
 0xbca   : > { %1950 = vadd.xlane.f32.xlu1 %v1949_v17 }
 0xbcb   : > { %2266 = vmatpush1.bf16.msra.mxu1 %v4524_v25 }
 0xbcc   : > { %2267 = vmatprep.subr.bf16.mxu1 %v4532_v28 }
 0xbcf   : > { %2268 = vmatpush1.bf16.msra.mxu1 %v4530_v30 }
 0xbd0   : > { %2269 = vmatprep.subr.bf16.mxu1 %v4538_v32 }
 0xbd3   : > { %2270 = vmatpush1.bf16.msra.mxu1 %v4536_v3 }
 0xbd4   : > { %4232 = vmatprep.subr.bf16.mxu1 %v4767_v61 }
 0xc57   : > { %v1951_v34 = vpop.xlane.xlu1 %1950 }
 0xc58   : > { %v1952_v36 = vmul.f32 0.0078125, %v1951_v34 }
 0xc5a   : > { %v1953_v37 = vadd.f32 1e-05, %v1952_v36 }
 0xc5c   : > { %4671 = vrsqrt.f32 %v1953_v37 }
 0xc66   : > { %v4672_v38 = vpop.eup %4671 }
 0xc67   : > { %v1955_v39 = vmul.f32 %v4672_v38, %v5404_v16 }
 0xc69   : > { %v1956_v43 = vpack.c.bf16 %v1955_v39, %v1955_v39 }
 0xc6b   : > { %2247 = vmatmul.mubr.bf16.vlgmr.msra.gmra.mrb[24].mxu0 %v1956_v43  ;;  %2288 = vmatmul.mubr.bf16.vlgmr.msra.gmra.mrb[40].mxu1 %v1956_v43 }
 0xc6c   : > { %4213 = vmatpush3.bf16.msra.mxu0 %v4539_v40  ;;  %4228 = vmatprep.mubr.msk.bf16.mxu0 %vm4768_vm4, %v4767_v61 }
 0xc6d   : > { %4214 = vmatprep.subr.bf16.mxu0 %v4767_v61  ;;  %4234 = vmatprep.mubr.msk.bf16.mxu1 %vm4768_vm4, %v4767_v61 }
 0xc70   : > { %4215 = vmatpush3.bf16.msra.mxu0 %v4540_v44 }
 0xc71   : > { %4216 = vmatprep.subr.bf16.mxu0 %v4767_v61 }
 0xc74   : > { %4217 = vmatpush3.bf16.msra.mxu0 %v4541_v45 }
 0xc75   : > { %4218 = vmatprep.subr.bf16.mxu0 %v4767_v61 }
 0xc78   : > { %4219 = vmatpush3.bf16.msra.mxu0 %v4542_v46 }
 0xc79   : > { %4220 = vmatprep.subr.bf16.mxu0 %v4767_v61 }
 0xc7c   : > { %4221 = vmatpush3.bf16.msra.mxu0 %v4543_v47 }
 0xc7d   : > { %4222 = vmatprep.subr.bf16.mxu0 %v4767_v61 }
 0xc80   : > { %4223 = vmatpush3.bf16.msra.mxu0 %v4544_v48 }
 0xc81   : > { %4224 = vmatprep.subr.bf16.mxu0 %v4767_v61 }
 0xc84   : > { %4225 = vmatpush3.bf16.msra.mxu0 %v4545_v18 }
 0xc85   : > { %4226 = vmatprep.subr.bf16.mxu0 %v4767_v61 }
 0xc88   : > { %4227 = vmatpush3.bf16.msra.mxu0 %v4546_v49 }
 0xc89   : > { %4256 = vmatprep.subr.bf16.mxu0 %v4767_v61 }
 0xc8b   : > { %4229 = vmatmul.mubr.bf16.vlgmr.msra.gmra.mrb[28].mxu0 %v1956_v43 }
 0xc8c   : > { %4258 = vmatprep.mubr.msk.bf16.mxu0 %vm4768_vm4, %v4767_v61 }
 0xd3e   : > { %v2248_v50 = vpop.f32.mrb[24].mxu0  ;;  %v2289_v51 = vpop.f32.mrb[40].mxu1 }
 0xd3f   : > { %v2336_v52 = vmul.f32 %v2248_v50, %v5076_v13  ;;  %v2339_v53 = vmul.f32 %v2289_v51, %v5076_v13  ;;  %v2250_v54 = vpop.f32.mrb[25].mxu0  ;;  %v2291_v55 = vpop.f32.mrb[41].mxu1 }
 0xd40   : > { %v2337_v41 = vmul.f32 %v2250_v54, %v5081_v14  ;;  %v2340_v35 = vmul.f32 %v2291_v55, %v5081_v14  ;;  %v2252_v56 = vpop.f32.mrb[26].mxu0  ;;  %v2293_v57 = vpop.f32.mrb[42].mxu1 }
 0xd41   : > { %v2253_v58 = vpop.f32.mrb[27].mxu0  ;;  %v2294_v59 = vpop.f32.mrb[43].mxu1 }
 0xd42   : > { %v2338_v60 = vadd.f32 %v2337_v41, %v2336_v52  ;;  %v2341_v62 = vadd.f32 %v2340_v35, %v2339_v53 }
 0xd44   : > { %v2343_v63 = vpack.c.bf16 %v2341_v62, %v2341_v62  ;;  %v2342_v13 = vpack.c.bf16 %v2338_v60, %v2338_v60 }
 0xd46   : > { %2454 = vrot.lane.b32.xlu1 %v2343_v63, %s4770_s26  ;;  %v2349_v1 = vsel %vm913_vm5, %v2343_v63, 0 }
 0xd47   : > { %4233 = vmatpush3.bf16.xpose.msra.mxu1 %v2349_v1 }
 0xd48   : > { %4238 = vmatprep.subr.bf16.mxu1 %v4767_v61 }
 0xd4a   : > { %2566 = vrot.lane.b32.xlu1 %v2343_v63, %s4771_s27 }
 0xd4e   : > { %2564 = vrot.lane.b32.xlu1 %v2342_v13, %s4771_s27  ;;  %4235 = vmatmul.mubr.msk.bf16.vlgmr.msra.gmra.mrb[44].mxu1 %vm913_vm5, %v2342_v13 }
 0xd4f   : > { %4240 = vmatprep.mubr.msk.bf16.mxu1 %vm4768_vm4, %v4767_v61 }
 0xd52   : > { %2675 = vrot.lane.b32.xlu1 %v2342_v13, %s5879_s21 }
 0xd5e   : > { %v2330_v14 = vpop.f32.mrb[28].mxu0 }
 0xd5f   : > { %v5510_v2 = vpack.c.bf16 %v2330_v14, %v2330_v14  ;;  %v4230_v4 = vpop.f32.mrb[29].mxu0 }
 0xd60   : > { %v2333_v5 = vpop.f32.mrb[30].mxu0 }
 0xd61   : > { %v4231_v6 = vpop.f32.mrb[31].mxu0  ;;  %v2408_v7 = vsel %vm977_vm6, %v5510_v2, 0 }
 0xd62   : > { %4239 = vmatpush3.bf16.msra.mxu1 %v2408_v7 }
 0xd63   : > { %4244 = vmatprep.subr.bf16.mxu1 %v4767_v61 }
 0xdb8   : > { %v2455_v8 = vpop.permute.xlu1 %2454 }
 0xdb9   : > { %v2460_v48 = vsel %vm913_vm5, %v2455_v8, 0 }
 0xdbc   : > { %v2567_v9 = vpop.permute.xlu1 %2566 }
 0xdbd   : > { %v2572_v10 = vsel %vm913_vm5, %v2567_v9, 0 }
 0xdbe   : > { %4257 = vmatpush3.bf16.xpose.msra.mxu0 %v2572_v10 }
 0xdbf   : > { %4268 = vmatprep.subr.bf16.mxu0 %v4767_v61 }
 0xdc0   : > { %v2565_v11 = vpop.permute.xlu1 %2564 }
 0xdc4   : > { %v2676_v33 = vpop.permute.xlu1 %2675 }
 0xdc5   : > { %4259 = vmatmul.mubr.msk.bf16.vlgmr.msra.gmra.mrb[32].mxu0 %vm913_vm5, %v2565_v11 }
 0xdc6   : > { %4270 = vmatprep.mubr.msk.bf16.mxu0 %vm4768_vm4, %v4767_v61 }
 0xe21   : > { %v2385_v12 = vpop.f32.mrb[44].mxu1 }
 0xe22   : > { %v2391_v15 = vsel %vm5100_vm7, %v2385_v12, -1e+30  ;;  %v4236_v17 = vpop.f32.mrb[45].mxu1 }
 0xe23   : > { %v2388_v20 = vpop.f32.mrb[46].mxu1  ;;  %v2392_v21 = vsel %vm961_vm8, %v2391_v15, -inf }
 0xe24   : > { %2393 = vmax.xlane.f32.xlu0 %v2392_v21  ;;  %v4237_v22 = vpop.f32.mrb[47].mxu1 }
 0xe98   : > { %v2608_v19 = vpop.f32.mrb[32].mxu0 }
 0xe99   : > { %v2614_v23 = vsel %vm5100_vm7, %v2608_v19, -1e+30  ;;  %v4260_v24 = vpop.f32.mrb[33].mxu0 }
 0xe9a   : > { %v2611_v25 = vpop.f32.mrb[34].mxu0  ;;  %v2615_v26 = vsel %vm961_vm8, %v2614_v23, -inf }
 0xe9b   : > { %2616 = vmax.xlane.f32.xlu1 %v2615_v26  ;;  %v4261_v27 = vpop.f32.mrb[35].mxu0 }
 0xeb1   : > { %v2394_v28 = vpop.xlane.xlu0 %2393 }
 0xeb2   : > { %v2395_v29 = vsub.f32 %v2391_v15, %v2394_v28 }
 0xeb4   : > { %v2396_v30 = vmul.f32 1.442695, %v2395_v29 }
 0xeb6   : > { %4673 = vpow2.f32 %v2396_v30  ;;  %v4547_v30 = vld [vmem:[%s5867_s5 + $0x40] sm:$0xff]  }
 0xec0   : > { %v4674_v31 = vpop.eup %4673 }
 0xec1   : > { %v2398_v32 = vsel %vm961_vm8, %v4674_v31, 0.0 }
 0xec2   : > { %2399 = vadd.xlane.f32.xlu0 %v2398_v32  ;;  %v4549_v32 = vld [vmem:[%s5867_s5 + $0x50] sm:$0xff]  }
 0xed8   : > { %2451 = vrot.lane.b32.xlu0 %v2342_v13, %s4770_s26 }
 0xedc   : > { %2677 = vrot.lane.b32.xlu0 %v2343_v63, %s5879_s21 }
 0xf28   : > { %v2617_v3 = vpop.xlane.xlu1 %2616 }
 0xf29   : > { %v2618_v34 = vsub.f32 %v2614_v23, %v2617_v3  ;;  %v4551_v3 = vld [vmem:[%s5867_s5 + $0x60] sm:$0xff]  }
 0xf2b   : > { %v2619_v36 = vmul.f32 1.442695, %v2618_v34  ;;  %v4552_v34 = vld [vmem:[%s5867_s5 + $0x68] sm:$0xff]  }
 0xf2d   : > { %4675 = vpow2.f32 %v2619_v36  ;;  %v4553_v36 = vld [vmem:[%s5867_s5 + $0x70] sm:$0xff]  }
 0xf37   : > { %v5529_v37 = vpop.eup %4675 }
 0xf38   : > { %v2621_v38 = vsel %vm961_vm8, %v5529_v37, 0.0 }
 0xf39   : > { %2622 = vadd.xlane.f32.xlu1 %v2621_v38 }
 0xf4a   : > { %2516 = vrot.lane.b32.xlu1 %v5510_v2, %s4770_s26 }
 0xf4e   : > { %2738 = vrot.lane.b32.xlu1 %v5510_v2, %s5879_s21 }
 0xf4f   : > { %v2400_v39 = vpop.xlane.xlu0 %2399 }
 0xf50   : > { %4677 = vrcp.f32 %v2400_v39 }
 0xf53   : > { %v2452_v40 = vpop.permute.xlu0 %2451 }
 0xf57   : > { %v2678_v43 = vpop.permute.xlu0 %2677 }
 0xf58   : > { %v2683_v44 = vsel %vm913_vm5, %v2678_v43, 0  ;;  %v4554_v43 = vld [vmem:[%s5867_s5 + $0x78] sm:$0xff]  }
 0xf59   : > { %4269 = vmatpush3.bf16.xpose.msra.mxu0 %v2683_v44 }
 0xf5a   : > { %v4678_v45 = vpop.eup %4677  ;;  %4280 = vmatprep.subr.bf16.mxu0 %v4767_v61 }
 0xf5b   : > { %v2402_v46 = vmul.f32 %v4678_v45, %v4674_v31  ;;  %v4548_v31 = vld [vmem:[%s5867_s5 + $0x48] sm:$0xff]  }
 0xf5d   : > { %v2403_v47 = vpack.c.bf16 %v2402_v46, %v2402_v46 }
 0xf5f   : > { %4241 = vmatmul.mubr.msk.bf16.vlgmr.msra.gmra.mrb[48].mxu1 %vm961_vm8, %v2403_v47 }
 0xf60   : > { %4245 = vmatpush3.bf16.xpose.msra.mxu1 %v2460_v48  ;;  %4271 = vmatmul.mubr.msk.bf16.vlgmr.msra.gmra.mrb[36].mxu0 %vm913_vm5, %v2676_v33  ;;  %v4550_v33 = vld [vmem:[%s5867_s5 + $0x58] sm:$0xff]  }
 0xf61   : > { %4246 = vmatprep.mubr.msk.bf16.mxu1 %vm4768_vm4, %v4767_v61  ;;  %4250 = vmatprep.subr.bf16.mxu1 %v4767_v61 }
 0xf62   : > { %4296 = vmatprep.mubr.msk.bf16.mxu0 %vm4768_vm4, %v4767_v61  ;;  %4281 = vmatpush3.bf16.msra.mxu0 %v4547_v30  ;;  %v4597_v30 = vld [vmem:[%s5868_s6 + $0x1e0] ss:$16 sps:$4 sm:$0xff]  }
 0xf63   : > { %4282 = vmatprep.subr.bf16.mxu0 %v4767_v61 }
 0xf66   : > { %4283 = vmatpush3.bf16.msra.mxu0 %v4548_v31  ;;  %v4600_v31 = vld [vmem:[%s5868_s6 + $0x1e8] ss:$16 sps:$4 sm:$0xff]  }
 0xf67   : > { %4247 = vmatmul.mubr.msk.bf16.vlgmr.msra.gmra.mrb[52].mxu1 %vm913_vm5, %v2452_v40  ;;  %4284 = vmatprep.subr.bf16.mxu0 %v4767_v61 }
 0xf68   : > { %4252 = vmatprep.mubr.msk.bf16.mxu1 %vm4768_vm4, %v4767_v61 }
 0xf6a   : > { %4285 = vmatpush3.bf16.msra.mxu0 %v4549_v32 }
 0xf6b   : > { %4286 = vmatprep.subr.bf16.mxu0 %v4767_v61 }
 0xf6e   : > { %4287 = vmatpush3.bf16.msra.mxu0 %v4550_v33 }
 0xf6f   : > { %4288 = vmatprep.subr.bf16.mxu0 %v4767_v61 }
 0xf72   : > { %4289 = vmatpush3.bf16.msra.mxu0 %v4551_v3 }
 0xf73   : > { %4290 = vmatprep.subr.bf16.mxu0 %v4767_v61 }
 0xf76   : > { %4291 = vmatpush3.bf16.msra.mxu0 %v4552_v34 }
 0xf77   : > { %4292 = vmatprep.subr.bf16.mxu0 %v4767_v61 }
 0xf7a   : > { %4293 = vmatpush3.bf16.msra.mxu0 %v4553_v36 }
 0xf7b   : > { %4294 = vmatprep.subr.bf16.mxu0 %v4767_v61 }
 0xf7e   : > { %4295 = vmatpush3.bf16.msra.mxu0 %v4554_v43  ;;  %v4606_v43 = vld [vmem:[%s5869_s7 + $0x88] sm:$0xff]  }
 0xfc6   : > { %v2623_v18 = vpop.xlane.xlu1 %2622 }
 0xfca   : > { %v2517_v49 = vpop.permute.xlu1 %2516 }
 0xfcb   : > { %v2522_v50 = vsel %vm977_vm6, %v2517_v49, 0 }
 0xfcc   : > { %4251 = vmatpush3.bf16.msra.mxu1 %v2522_v50 }
 0xfcd   : > { %4262 = vmatprep.subr.bf16.mxu1 %v4767_v61 }
 0xfce   : > { %v2739_v24 = vpop.permute.xlu1 %2738 }
 0xfcf   : > { %v2744_v27 = vsel %vm977_vm6, %v2739_v24, 0  ;;  %v4593_v24 = vld [vmem:[%s5868_s6 + $0x1c4] ss:$16 sps:$4 sm:$0xff]  }
0x1032   : > { %v5552_v51 = vpop.f32.mrb[48].mxu1 }
0x1033   : > { %v4242_v52 = vpop.f32.mrb[49].mxu1  ;;  %v2719_v53 = vpop.f32.mrb[36].mxu0 }
0x1034   : > { %v2447_v54 = vpop.f32.mrb[50].mxu1  ;;  %v4272_v55 = vpop.f32.mrb[37].mxu0  ;;  %v2725_v63 = vsel %vm5100_vm7, %v2719_v53, -1e+30 }
0x1035   : > { %v4243_v41 = vpop.f32.mrb[51].mxu1  ;;  %v2722_v35 = vpop.f32.mrb[38].mxu0  ;;  %v2726_v13 = vsel %vm961_vm8, %v2725_v63, -inf }
0x1036   : > { %v4273_v56 = vpop.f32.mrb[39].mxu0 }
0x1037   : > { %v4555_v56 = vld [vmem:[%s5868_s6 + $0x100] ss:$16 sps:$4 sm:$0xff]  }
0x103a   : > { %v2496_v57 = vpop.f32.mrb[52].mxu1 }
0x103b   : > { %v2502_v58 = vsel %vm5100_vm7, %v2496_v57, -1e+30  ;;  %v4248_v59 = vpop.f32.mrb[53].mxu1  ;;  %v4557_v57 = vld [vmem:[%s5868_s6 + $0x104] ss:$16 sps:$4 sm:$0xff]  }
0x103c   : > { %v2499_v60 = vpop.f32.mrb[54].mxu1  ;;  %v2503_v62 = vsel %vm961_vm8, %v2502_v58, -inf  ;;  %v4563_v59 = vld [vmem:[%s5868_s6 + $0x124] ss:$16 sps:$4 sm:$0xff]  }
0x103d   : > { %2504 = vmax.xlane.f32.xlu0 %v2503_v62  ;;  %v4249_v1 = vpop.f32.mrb[55].mxu1  ;;  %v4566_v60 = vld [vmem:[%s5868_s6 + $0x12c] ss:$16 sps:$4 sm:$0xff]   ;;  %v4561_v62 = vld [vmem:[%s5868_s6 + $0x120] ss:$16 sps:$4 sm:$0xff]  }
0x103e   : > { %v4569_v1 = vld [vmem:[%s5868_s6 + $0x144] ss:$16 sps:$4 sm:$0xff]  }
0x1041   : > { %2727 = vmax.xlane.f32.xlu0 %v2726_v13  ;;  %v4572_v13 = vld [vmem:[%s5868_s6 + $0x14c] ss:$16 sps:$4 sm:$0xff]  }
0x10ca   : > { %v2505_v14 = vpop.xlane.xlu0 %2504 }
0x10cb   : > { %v2506_v4 = vsub.f32 %v2502_v58, %v2505_v14  ;;  %v4560_v58 = vld [vmem:[%s5868_s6 + $0x10c] ss:$16 sps:$4 sm:$0xff]   ;;  %v4567_v14 = vld [vmem:[%s5868_s6 + $0x140] ss:$16 sps:$4 sm:$0xff]  }
0x10cc   : > { %3150 = vmatprep.subr.bf16.mxu0 %v4560_v58 }
0x10cd   : > { %v2507_v5 = vmul.f32 1.442695, %v2506_v4  ;;  %v4570_v4 = vld [vmem:[%s5868_s6 + $0x148] ss:$16 sps:$4 sm:$0xff]  }
0x10ce   : > { %v2728_v6 = vpop.xlane.xlu0 %2727 }
0x10cf   : > { %4679 = vpow2.f32 %v2507_v5  ;;  %v2729_v7 = vsub.f32 %v2725_v63, %v2728_v6  ;;  %v4564_v63 = vld [vmem:[%s5868_s6 + $0x128] ss:$16 sps:$4 sm:$0xff]   ;;  %v4575_v5 = vld [vmem:[%s5868_s6 + $0x164] ss:$16 sps:$4 sm:$0xff]   ;;  %v4578_v6 = vld [vmem:[%s5868_s6 + $0x16c] ss:$16 sps:$4 sm:$0xff]  }
0x10d1   : > { %v2730_v8 = vmul.f32 1.442695, %v2729_v7  ;;  %v4573_v7 = vld [vmem:[%s5868_s6 + $0x160] ss:$16 sps:$4 sm:$0xff]  }
0x10d3   : > { %4681 = vpow2.f32 %v2730_v8  ;;  %v4576_v8 = vld [vmem:[%s5868_s6 + $0x168] ss:$16 sps:$4 sm:$0xff]  }
0x10d9   : > { %v4680_v9 = vpop.eup %4679 }
0x10da   : > { %v2509_v10 = vsel %vm961_vm8, %v4680_v9, 0.0 }
0x10db   : > { %2510 = vadd.xlane.f32.xlu0 %v2509_v10 }
0x10dd   : > { %v4682_v11 = vpop.eup %4681 }
0x10de   : > { %v2732_v42 = vsel %vm961_vm8, %v4682_v11, 0.0 }
0x10df   : > { %2733 = vadd.xlane.f32.xlu0 %v2732_v42 }
0x10f5   : > { %2627 = vrot.lane.b32.xlu0 %v5510_v2, %s4771_s27 }
0x1168   : > { %v2511_v12 = vpop.xlane.xlu0 %2510 }
0x1169   : > { %4683 = vrcp.f32 %v2511_v12 }
0x116a   : > { %4685 = vrcp.f32 %v2623_v18 }
0x116c   : > { %v2734_v15 = vpop.xlane.xlu0 %2733 }
0x116d   : > { %4687 = vrcp.f32 %v2734_v15 }
0x1170   : > { %v2628_v21 = vpop.permute.xlu0 %2627 }
0x1171   : > { %v2633_v23 = vsel %vm977_vm6, %v2628_v21, 0  ;;  %v4582_v21 = vld [vmem:[%s5868_s6 + $0x188] ss:$16 sps:$4 sm:$0xff]  }
0x1173   : > { %v4684_v17 = vpop.eup %4683 }
0x1174   : > { %v2513_v20 = vmul.f32 %v4684_v17, %v4680_v9  ;;  %v4686_v19 = vpop.eup %4685  ;;  %v4581_v17 = vld [vmem:[%s5868_s6 + $0x184] ss:$16 sps:$4 sm:$0xff]  }
0x1175   : > { %v2625_v2 = vmul.f32 %v4686_v19, %v5529_v37  ;;  %v4585_v19 = vld [vmem:[%s5868_s6 + $0x1a0] ss:$16 sps:$4 sm:$0xff]  }
0x1176   : > { %v2514_v22 = vpack.c.bf16 %v2513_v20, %v2513_v20  ;;  %v4584_v20 = vld [vmem:[%s5868_s6 + $0x18c] ss:$16 sps:$4 sm:$0xff]  }
0x1177   : > { %v2626_v25 = vpack.c.bf16 %v2625_v2, %v2625_v2  ;;  %v4688_v26 = vpop.eup %4687  ;;  %v4590_v2 = vld [vmem:[%s5868_s6 + $0x1ac] ss:$16 sps:$4 sm:$0xff]  }
0x1178   : > { %4253 = vmatmul.mubr.msk.bf16.vlgmr.msra.gmra.mrb[56].mxu1 %vm961_vm8, %v2514_v22  ;;  %v2736_v28 = vmul.f32 %v4688_v26, %v4682_v11  ;;  %v4587_v22 = vld [vmem:[%s5868_s6 + $0x1a4] ss:$16 sps:$4 sm:$0xff]   ;;  %v4591_v26 = vld [vmem:[%s5868_s6 + $0x1c0] ss:$16 sps:$4 sm:$0xff]  }
0x1179   : > { %4263 = vmatpush3.bf16.msra.mxu1 %v2633_v23  ;;  %4264 = vmatprep.mubr.msk.bf16.mxu1 %vm4768_vm4, %v4767_v61  ;;  %v4588_v23 = vld [vmem:[%s5868_s6 + $0x1a8] ss:$16 sps:$4 sm:$0xff]  }
0x117a   : > { %4274 = vmatprep.subr.bf16.mxu1 %v4767_v61  ;;  %v2737_v29 = vpack.c.bf16 %v2736_v28, %v2736_v28  ;;  %v4599_v28 = vld [vmem:[%s5868_s6 + $0x1e4] ss:$16 sps:$4 sm:$0xff]  }
0x1180   : > { %4265 = vmatmul.mubr.msk.bf16.vlgmr.msra.gmra.mrb[60].mxu1 %vm961_vm8, %v2626_v25  ;;  %v4596_v25 = vld [vmem:[%s5868_s6 + $0x1cc] ss:$16 sps:$4 sm:$0xff]  }
0x1181   : > { %4275 = vmatpush3.bf16.msra.mxu1 %v2744_v27  ;;  %4276 = vmatprep.mubr.msk.bf16.mxu1 %vm4768_vm4, %v4767_v61  ;;  %v4594_v27 = vld [vmem:[%s5868_s6 + $0x1c8] ss:$16 sps:$4 sm:$0xff]  }
0x1182   : > { %3109 = vmatprep.subr.bf16.mxu1 %v4557_v57 }
0x1188   : > { %4277 = vmatmul.mubr.msk.bf16.vlgmr.msra.gmra.mrb[64].mxu1 %vm961_vm8, %v2737_v29  ;;  %v4602_v29 = vld [vmem:[%s5868_s6 + $0x1ec] ss:$16 sps:$4 sm:$0xff]  }
0x1189   : > { %3141 = vmatprep.mubr.bf16.mxu1 %v4765_v0  ;;  %3110 = vmatpush1.bf16.msra.mxu1 %v4555_v56 }
0x118a   : > { %3111 = vmatprep.subr.bf16.mxu1 %v4563_v59 }
0x118d   : > { %3112 = vmatpush1.bf16.msra.mxu1 %v4561_v62 }
0x118e   : > { %3113 = vmatprep.subr.bf16.mxu1 %v4569_v1 }
0x1191   : > { %3114 = vmatpush1.bf16.msra.mxu1 %v4567_v14 }
0x1192   : > { %3115 = vmatprep.subr.bf16.mxu1 %v4575_v5 }
0x1195   : > { %3116 = vmatpush1.bf16.msra.mxu1 %v4573_v7 }
0x1196   : > { %3117 = vmatprep.subr.bf16.mxu1 %v4581_v17  ;;  %v4622_v17 = vld [vmem:[%s5870_s8 + $0x10] ss:$8 sps:$4 sm:$0xff]  }
0x124b   : > { %v2558_v37 = vpop.f32.mrb[56].mxu1 }
0x124c   : > { %2787 = vrot.lane.b32.xlu1 %v2558_v37, %s5879_s21  ;;  %v4254_v38 = vpop.f32.mrb[57].mxu1 }
0x124d   : > { %v2561_v39 = vpop.f32.mrb[58].mxu1  ;;  %v4603_v38 = vld [vmem:[%s5869_s7 + $0xc0] sm:$0xff]  }
0x124e   : > { %v4255_v40 = vpop.f32.mrb[59].mxu1  ;;  %v4604_v39 = vld [vmem:[%s5869_s7 + $0x80] sm:$0xff]  }
0x124f   : > { %v4605_v40 = vld [vmem:[%s5869_s7 + $0xc8] sm:$0xff]  }
0x1253   : > { %v2669_v44 = vpop.f32.mrb[60].mxu1 }
0x1254   : > { %2791 = vrot.lane.b32.xlu0 %v2669_v44, %s4771_s27  ;;  %v4266_v45 = vpop.f32.mrb[61].mxu1  ;;  %v4608_v44 = vld [vmem:[%s5869_s7 + $0x90] sm:$0xff]   ;;  %s323_s27 = scalar_lea.vmem [#allocation2], %s3604_s29 }
0x1255   : > { %v2672_v46 = vpop.f32.mrb[62].mxu1  ;;  %v4609_v45 = vld [vmem:[%s5869_s7 + $0xd8] sm:$0xff]   ;;  %s3541_s21 = sshll.u32 %s323_s27, 4  ;;  %s5817_s21 = int_to_ptr.vmem [resolvable:$true] %s3541_s21 }
0x1256   : > { %v4267_v47 = vpop.f32.mrb[63].mxu1  ;;  %v4610_v46 = vld [vmem:[%s5869_s7 + $0x98] sm:$0xff]   ;;  %s4701_s22 = scalar_lea.vmem %s5817_s21, 256 }
0x1257   : > { %v4611_v47 = vld [vmem:[%s5869_s7 + $0xe0] sm:$0xff]   ;;  %p4702_p11 = scmp.ne.s32.totalorder %s5817_s21, %s4701_s22 }
0x1259   : > { %p4703_p12 = pnand %p4702_p11, %p4861_p5 }
0x125b   : > { %v2780_v48 = vpop.f32.mrb[64].mxu1  ;;  %p4704_p13 = pneg %p4703_p12 }
0x125c   : > { %2795 = vrot.lane.b32.xlu1 %v2780_v48, %s4770_s26  ;;  %v4278_v18 = vpop.f32.mrb[65].mxu1  ;;  %v4612_v48 = vld [vmem:[%s5869_s7 + $0xa0] sm:$0xff]   ;;  %s3989_s26 = sshll.u32 %s4844_s13, 8  ;;  %s4772_s13 = smov [#allocation2]  }
0x125d   : > { %v2783_v49 = vpop.f32.mrb[66].mxu1  ;;  %v4613_v18 = vld [vmem:[%s5869_s7 + $0xe8] sm:$0xff]   ;;  %s5822_s16 = scalar_lea.hbm %s5871_s9, %s3989_s26  ;;  %s4705_s24 = sshll.u32 %s4772_s13, 4  ;;  %s4706_s24 = int_to_ptr.vmem [resolvable:$false] %s4705_s24 }
0x125e   : > { %v4279_v50 = vpop.f32.mrb[67].mxu1  ;;  %v4614_v49 = vld [vmem:[%s5869_s7 + $0xa8] sm:$0xff]   ;;  %s4707_s25 = scalar_lea.vmem %s4706_s24, 512  ;;  %p4708_p0 = scmp.lt.s32.totalorder %s5817_s21, %s4706_s24 }
0x125f   : > { %v4615_v50 = vld [vmem:[%s5869_s7 + $0xf0] sm:$0xff]   ;;  %p4709_p1 = scmp.lt.s32.totalorder %s4707_s25, %s4701_s22 }
0x1261   : > { %p4710_p2 = por %p4709_p1, %p4708_p0 }
0x1263   : > { %p4711_p3 = pnand %p4710_p2, %p4704_p13 }
0x12be   : > { %v2788_v52 = vpop.permute.xlu1 %2787 }
0x12bf   : > { %v2798_v53 = vsel %vm913_vm5, %v5552_v51, %v2788_v52  ;;  %v4558_v51 = vld [vmem:[%s5868_s6 + $0x108] ss:$16 sps:$4 sm:$0xff]   ;;  %v4616_v52 = vld [vmem:[%s5869_s7 + $0xb0] sm:$0xff]  }
0x12c6   : > { %v2792_v61 = vpop.permute.xlu0 %2791 }
0x12c7   : > { %v2799_v54 = vsel %vm1370_vm9, %v2798_v53, %v2792_v61  ;;  %v4617_v61 = vld [vmem:[%s5869_s7 + $0xf8] sm:$0xff]  }
0x12c8   : > { %v4618_v53 = vld [vmem:[%s5869_s7 + $0xb8] sm:$0xff]  }
0x12ce   : > { %v2796_v55 = vpop.permute.xlu1 %2795 }
0x12cf   : > { %v2800_v41 = vsel %vm1372_vm10, %v2799_v54, %v2796_v55 }
0x12d0   : > { %v2801_v35 = vpack.c.bf16 %v2800_v41, %v2800_v41 }
0x12d2   : > { %4297 = vmatmul.mubr.bf16.vlgmr.msra.gmra.mrb[40].mxu0 %v2801_v35 }
0x12d3   : > { %3182 = vmatprep.mubr.bf16.mxu0 %v4765_v0  ;;  %3151 = vmatpush1.bf16.msra.mxu0 %v4558_v51 }
0x12d4   : > { %3152 = vmatprep.subr.bf16.mxu0 %v4566_v60 }
0x12d7   : > { %3153 = vmatpush1.bf16.msra.mxu0 %v4564_v63 }
0x12d8   : > { %3154 = vmatprep.subr.bf16.mxu0 %v4572_v13 }
0x12db   : > { %3155 = vmatpush1.bf16.msra.mxu0 %v4570_v4 }
0x12dc   : > { %3156 = vmatprep.subr.bf16.mxu0 %v4578_v6 }
0x12df   : > { %3157 = vmatpush1.bf16.msra.mxu0 %v4576_v8 }
0x12e0   : > { %3158 = vmatprep.subr.bf16.mxu0 %v4584_v20  ;;  %v4627_v20 = vld [vmem:[%s5870_s8 + $0x24] ss:$8 sps:$4 sm:$0xff]  }
0x12e3   : > { %3159 = vmatpush1.bf16.msra.mxu0 %v4582_v21  ;;  %v4630_v21 = vld [vmem:[%s5870_s8 + $0x34] ss:$8 sps:$4 sm:$0xff]  }
0x12e4   : > { %3160 = vmatprep.subr.bf16.mxu0 %v4590_v2 }
0x12e7   : > { %3161 = vmatpush1.bf16.msra.mxu0 %v4588_v23 }
0x12e8   : > { %3162 = vmatprep.subr.bf16.mxu0 %v4596_v25 }
0x12eb   : > { %3163 = vmatpush1.bf16.msra.mxu0 %v4594_v27 }
0x12ec   : > { %3164 = vmatprep.subr.bf16.mxu0 %v4602_v29  ;;  %v4631_v29 = vld [vmem:[%s5870_s8 + $0x40] ss:$8 sps:$4 sm:$0xff]  }
0x12ef   : > { %3165 = vmatpush1.bf16.msra.mxu0 %v4600_v31  ;;  %v4639_v31 = vld [vmem:[%s5870_s8 + $0x64] ss:$8 sps:$4 sm:$0xff]  }
0x13a5   : > { %v2901_v9 = vpop.f32.mrb[40].mxu0 }
0x13a6   : > { %v5664_v10 = vadd.f32 %v2901_v9, %v5404_v16  ;;  %v4298_v11 = vpop.f32.mrb[41].mxu0  ;;  %v4579_v16 = vld [vmem:[%s5868_s6 + $0x180] ss:$16 sps:$4 sm:$0xff]  }
0x13a7   : > { %v2904_v42 = vpop.f32.mrb[42].mxu0  ;;  %3118 = vmatpush1.bf16.msra.mxu1 %v4579_v16  ;;  %v4625_v16 = vld [vmem:[%s5870_s8 + $0x20] ss:$8 sps:$4 sm:$0xff]  }
0x13a8   : > { %v4299_v12 = vpop.f32.mrb[43].mxu0  ;;  %v2908_v15 = vmul.f32 %v5664_v10, %v5664_v10  ;;  %3119 = vmatprep.subr.bf16.mxu1 %v4587_v22  ;;  %v4619_v42 = vld [vmem:[%s5870_s8] ss:$8 sps:$4 sm:$0xff]   ;;  %v4628_v22 = vld [vmem:[%s5870_s8 + $0x30] ss:$8 sps:$4 sm:$0xff]  }
0x13a9   : > { %v4621_v12 = vld [vmem:[%s5870_s8 + $0x4] ss:$8 sps:$4 sm:$0xff]  }
0x13aa   : > { %2909 = vadd.xlane.f32.xlu0 %v2908_v15  ;;  %v4624_v15 = vld [vmem:[%s5870_s8 + $0x14] ss:$8 sps:$4 sm:$0xff]   ;;  %3483 = vmatprep.subr.bf16.mxu0 %v4621_v12 }
0x13ab   : > { %3120 = vmatpush1.bf16.msra.mxu1 %v4585_v19 }
0x13ac   : > { %3121 = vmatprep.subr.bf16.mxu1 %v4593_v24 }
0x13af   : > { %3122 = vmatpush1.bf16.msra.mxu1 %v4591_v26 }
0x13b0   : > { %3123 = vmatprep.subr.bf16.mxu1 %v4599_v28  ;;  %v4633_v28 = vld [vmem:[%s5870_s8 + $0x44] ss:$8 sps:$4 sm:$0xff]  }
0x13b3   : > { %3124 = vmatpush1.bf16.msra.mxu1 %v4597_v30  ;;  %v4636_v30 = vld [vmem:[%s5870_s8 + $0x54] ss:$8 sps:$4 sm:$0xff]  }
0x13b4   : > { %4102 = vmatprep.subr.bf16.mxu1 %v4603_v38 }
0x1437   : > { %v2910_v32 = vpop.xlane.xlu0 %2909 }
0x1438   : > { %v2911_v33 = vmul.f32 0.0078125, %v2910_v32  ;;  %v4637_v32 = vld [vmem:[%s5870_s8 + $0x60] ss:$8 sps:$4 sm:$0xff]  }
0x143a   : > { %v2912_v3 = vadd.f32 1e-05, %v2911_v33  ;;  %v4642_v33 = vld [vmem:[%s5870_s8 + $0x74] ss:$8 sps:$4 sm:$0xff]  }
0x143c   : > { %4689 = vrsqrt.f32 %v2912_v3  ;;  %v4640_v3 = vld [vmem:[%s5870_s8 + $0x70] ss:$8 sps:$4 sm:$0xff]  }
0x1446   : > { %v4690_v34 = vpop.eup %4689 }
0x1447   : > { %v2914_v36 = vmul.f32 %v4690_v34, %v5664_v10 }
0x1449   : > { %v2915_v37 = vpack.c.bf16 %v2914_v36, %v2914_v36 }
0x144b   : > { %3142 = vmatmul.mubr.bf16.vlgmr.msra.gmra.mrb[68].mxu1 %v2915_v37  ;;  %3183 = vmatmul.mubr.bf16.vlgmr.msra.gmra.mrb[44].mxu0 %v2915_v37 }
0x144c   : > { %3515 = vmatprep.mubr.bf16.mxu0 %v4765_v0  ;;  %4103 = vmatpush3.bf16.msra.mxu1 %v4604_v39  ;;  %v4607_v0 = vld [vmem:[%s5869_s7 + $0xd0] sm:$0xff]  }
0x144d   : > { %4104 = vmatprep.subr.bf16.mxu1 %v4605_v40  ;;  %3484 = vmatpush1.bf16.msra.mxu0 %v4619_v42 }
0x144e   : > { %3485 = vmatprep.subr.bf16.mxu0 %v4624_v15 }
0x1450   : > { %4105 = vmatpush3.bf16.msra.mxu1 %v4606_v43 }
0x1451   : > { %4106 = vmatprep.subr.bf16.mxu1 %v4607_v0  ;;  %3486 = vmatpush1.bf16.msra.mxu0 %v4622_v17 }
0x1452   : > { %3487 = vmatprep.subr.bf16.mxu0 %v4627_v20 }
0x1454   : > { %4107 = vmatpush3.bf16.msra.mxu1 %v4608_v44 }
0x1455   : > { %4108 = vmatprep.subr.bf16.mxu1 %v4609_v45  ;;  %3488 = vmatpush1.bf16.msra.mxu0 %v4625_v16 }
0x1456   : > { %3489 = vmatprep.subr.bf16.mxu0 %v4630_v21 }
0x1458   : > { %4109 = vmatpush3.bf16.msra.mxu1 %v4610_v46 }
0x1459   : > { %4110 = vmatprep.subr.bf16.mxu1 %v4611_v47  ;;  %3490 = vmatpush1.bf16.msra.mxu0 %v4628_v22 }
0x145a   : > { %3491 = vmatprep.subr.bf16.mxu0 %v4633_v28 }
0x145c   : > { %4111 = vmatpush3.bf16.msra.mxu1 %v4612_v48 }
0x145d   : > { %4112 = vmatprep.subr.bf16.mxu1 %v4613_v18  ;;  %3492 = vmatpush1.bf16.msra.mxu0 %v4631_v29 }
0x145e   : > { %3493 = vmatprep.subr.bf16.mxu0 %v4636_v30 }
0x1460   : > { %4113 = vmatpush3.bf16.msra.mxu1 %v4614_v49 }
0x1461   : > { %4114 = vmatprep.subr.bf16.mxu1 %v4615_v50 }
0x1464   : > { %4115 = vmatpush3.bf16.msra.mxu1 %v4616_v52 }
0x1465   : > { %4116 = vmatprep.subr.bf16.mxu1 %v4617_v61 }
0x1468   : > { %4117 = vmatpush3.bf16.msra.mxu1 %v4618_v53 }
0x151e   : > { %v3143_v54 = vpop.f32.mrb[68].mxu1  ;;  %v3184_v55 = vpop.f32.mrb[44].mxu0 }
0x151f   : > { %v3918_v41 = vmul.f32 -1.442695, %v3143_v54  ;;  %v3145_v35 = vpop.f32.mrb[69].mxu1  ;;  %v3186_v56 = vpop.f32.mrb[45].mxu0 }
0x1520   : > { %v3919_v57 = vmul.f32 -1.442695, %v3145_v35  ;;  %v3147_v51 = vpop.f32.mrb[70].mxu1  ;;  %v3188_v58 = vpop.f32.mrb[46].mxu0 }
0x1521   : > { %4691 = vpow2.f32 %v3918_v41  ;;  %v3148_v59 = vpop.f32.mrb[71].mxu1  ;;  %v3189_v60 = vpop.f32.mrb[47].mxu0 }
0x1522   : > { %4693 = vpow2.f32 %v3919_v57 }
0x152b   : > { %v4692_v62 = vpop.eup %4691 }
0x152c   : > { %v4694_v63 = vpop.eup %4693  ;;  %v3197_v1 = vadd.f32 1.0, %v4692_v62 }
0x152d   : > { %v3198_v13 = vadd.f32 1.0, %v4694_v63 }
0x152e   : > { %4695 = vrcp.f32 %v3197_v1 }
0x152f   : > { %4697 = vrcp.f32 %v3198_v13 }
0x1538   : > { %v4696_v14 = vpop.eup %4695 }
0x1539   : > { %v4698_v4 = vpop.eup %4697  ;;  %v3203_v5 = vmul.f32 %v4696_v14, %v3143_v54 }
0x153a   : > { %v3204_v6 = vmul.f32 %v4698_v4, %v3145_v35 }
0x153b   : > { %v3205_v7 = vmul.f32 %v3203_v5, %v3184_v55 }
0x153c   : > { %v3206_v8 = vmul.f32 %v3204_v6, %v3186_v56 }
0x153d   : > { %v3207_v11 = vpack.c.bf16 %v3205_v7, %v3205_v7 }
0x153e   : > { %v3208_v9 = vpack.c.bf16 %v3206_v8, %v3206_v8 }
0x1540   : > { %3370 = vmatprep.mubr.bf16.mxu1 %v3208_v9 }
0x1541   : > { %3371 = vmatmul.mubr.bf16.vlgmr.msra.gmra.mrb[72].mxu1 %v3207_v11 }
0x1614   : > { %v4118_v19 = vpop.f32.mrb[72].mxu1 }
0x1615   : > { %v4119_v23 = vpop.f32.mrb[73].mxu1 }
0x1616   : > { %v4120_v2 = vadd.f32 %v4119_v23, %v4118_v19  ;;  %v4121_v24 = vpop.f32.mrb[74].mxu1 }
0x1617   : > { %v4122_v25 = vpop.f32.mrb[75].mxu1 }
0x1618   : > { %v3378_v26 = vadd.f32 %v4120_v2, %v5664_v10  ;;  %v4634_v10 = vld [vmem:[%s5870_s8 + $0x50] ss:$8 sps:$4 sm:$0xff]  }
0x1619   : > { %3494 = vmatpush1.bf16.msra.mxu0 %v4634_v10 }
0x161a   : > { %v3379_v27 = vmul.f32 %v3378_v26, %v3378_v26  ;;  %3495 = vmatprep.subr.bf16.mxu0 %v4639_v31 }
0x161c   : > { %3380 = vadd.xlane.f32.xlu1 %v3379_v27 }
0x161d   : > { %3496 = vmatpush1.bf16.msra.mxu0 %v4637_v32 }
0x161e   : > { %3497 = vmatprep.subr.bf16.mxu0 %v4642_v33 }
0x1621   : > { %3498 = vmatpush1.bf16.msra.mxu0 %v4640_v3 }
0x16a9   : > { %v3381_v34 = vpop.xlane.xlu1 %3380 }
0x16aa   : > { %v3382_v36 = vmul.f32 0.0078125, %v3381_v34 }
0x16ac   : > { %v3383_v37 = vadd.f32 1e-05, %v3382_v36 }
0x16ae   : > { %4699 = vrsqrt.f32 %v3383_v37 }
0x16b8   : > { %v4700_v38 = vpop.eup %4699 }
0x16b9   : > { %v3385_v39 = vmul.f32 %v4700_v38, %v3378_v26 }
0x16bb   : > { %v3386_v40 = vpack.c.bf16 %v3385_v39, %v3385_v39 }
0x16bd   : > { %3516 = vmatmul.mubr.bf16.vlgmr.msra.gmra.mrb[48].mxu0 %v3386_v40 }
0x1790   : > { %v3517_v43 = vpop.f32.mrb[48].mxu0 }
0x1791   : > { %3524 = vst [vmem:[%s323_s27] sm:$0xff] %v3517_v43  ;;  %v3519_v0 = vpop.f32.mrb[49].mxu0 }
0x1792   : > { %3525 = vst [vmem:[%s323_s27 + $0x8] sm:$0xff] %v3519_v0  ;;  %v3521_v44 = vpop.f32.mrb[50].mxu0 }
0x1793   : > { %v3522_v45 = vpop.f32.mrb[51].mxu0 }
0x1794   : > { %4714 = shalt.err (!%p4711_p3)
}
0x1795   : > { %s4715_s28 = scalar_lea.hbm %s5822_s16, 256  ;;  %s4719_s27 = scalar_lea.hbm %s5871_s9, 512 }
0x1796   : > { %p4716_p4 = scmp.ne.s32.totalorder %s5822_s16, %s4715_s28  ;;  %p4720_p9 = scmp.lt.u32.totalorder %s5822_s16, %s5871_s9 }
0x1797   : > { %p4721_p10 = scmp.lt.u32.totalorder %s4719_s27, %s4715_s28  ;;  %p4723_p12 = scmp.lt.u32.totalorder %s4715_s28, %s5822_s16 }
0x1798   : > { %p4717_p7 = pnand %p4716_p4, %p4861_p5 }
0x1799   : > { %p4722_p11 = por %p4721_p10, %p4720_p9 }
0x179a   : > { %p4718_p8 = pneg %p4717_p7 }
0x179b   : > { %p4724_p13 = por %p4723_p12, %p4722_p11 }
0x179d   : > { %p4725_p0 = pnand %p4724_p13, %p4718_p8 }
0x179f   : > { %4728 = shalt.err (!%p4725_p0)
}
0x17a0   : > { %4300 = dma.vmem_to_hbm [thread:$0]  (%p4861_p5), %s5817_s21, 256, %s5822_s16, %s3527_s17  }
0x17a1 PF: > { %p4306_p1 = scmp.ge.s32.totalorder %s4763_s12, 2  ;;  %s3553_s23 = sand.u32 1, %s4751_s30  }
0x17a2   : > { %s3554_s22 = scalar_lea.sflag [#allocation3], %s3553_s23 }
0x17a3   : > { %p4303_p2 = pnand %p4306_p1, %p4865_p6 }
0x17a5   : > { %4746 = dma.done.wait (!%p4303_p2), %s3554_s22, 256  }
0x17a6   : > { %4748 = vsyncadd (!%p4303_p2), %s3554_s22, 4294967040  ;;  %s5880_s13 = sld [smem:[#allocation5_spill]]  ;;  %p19_p3 = scmp.ge.s32.totalorder %s4848_s15, 4  }
0x17a7   : > { %s5881_s30 = smov %s4755_s10  ;;  %s5882_s10 = smov %s4759_s11 }
0x17a8   : > { %s5884_s12 = smov %s4848_s15  ;;  %21 = sbr.rel (!%p19_p3) target bundleno = 3 (0x3), region = 95 }
0x17ac   : > { %s5883_s11 = smov %s5880_s13 }
0x17af   :  { %3559 = vsyncpa [#allocation3], 1 }
0x17b0   :  { %3561 = vsyncpa [#allocation3 + $0x1], 1 }

</bundles_post_ra>
